<compile_context>
chip_gen: v5e
topology: v5e:2x2
jax: 0.10.0
libtpu: 0.0.40
codegen_flags: <defaults>
</compile_context>

<pallas_src>
import functools

import jax
import jax.numpy as jnp
from jax import lax
from jax.experimental import pallas as pl
from jax.experimental.pallas import tpu as pltpu

BN_EPS = 1e-5


def _round_up(v, m):
    return (v + m - 1) // m * m


# ----------------------------------------------------------------------------
# Fused kernel body.  Grid = (layer, edge_tile); scratch carries the residual
# stream `h`, the per-node aggregate and the per-layer [h@Wi ; h@Wj] slab.
# ----------------------------------------------------------------------------
def _cgc_fused_kernel(x_ref, e_ref, dstc_ref, srcc_ref, dstr_ref,
                      wi_ref, wj_ref, we_ref, b_ref, scale_ref, shift_ref,
                      pool_ref, wl_ref, bl_ref,
                      out_ref,
                      h_s, agg_s, hw_s,
                      *, n_pad, f_pad):
    l = pl.program_id(0)
    t = pl.program_id(1)
    n_layers = pl.num_programs(0)
    n_tiles = pl.num_programs(1)

    # ---- layer prologue: first edge tile of each layer -----------------------
    @pl.when(t == 0)
    def _prologue():
        @pl.when(l == 0)
        def _init_h():
            h_s[...] = x_ref[...]

        h = h_s[...].astype(jnp.bfloat16)                          # [N, Fp]
        hw_s[0:n_pad, :] = jnp.dot(                                # x_i path: h @ Wi
            h, wi_ref[0], preferred_element_type=jnp.float32).astype(jnp.bfloat16)
        hw_s[n_pad:2 * n_pad, :] = jnp.dot(                        # x_j path: h @ Wj
            h, wj_ref[0], preferred_element_type=jnp.float32).astype(jnp.bfloat16)
        agg_s[...] = jnp.zeros_like(agg_s)

    # ---- per edge tile --------------------------------------------------------
    dst = dstc_ref[...]                                            # [tE, 1] int32
    src = srcc_ref[...]                                            # [tE, 1] int32
    tile_e = dst.shape[0]

    # Combined gather one-hot built in-kernel: column dst[e] picks (h@Wi)[dst],
    # column n_pad + src[e] picks (h@Wj)[src].  Padded edges use dst = -1.
    lane = lax.broadcasted_iota(jnp.int32, (tile_e, 2 * n_pad), 1)
    gmat = jnp.where((lane == dst) | (lane == src + n_pad),
                     1.0, 0.0).astype(jnp.bfloat16)                # [tE, 2N]

    # Fused gate pre-activation (f-gate lanes [0,Fp), s-gate lanes [Fp,2Fp)).
    z = (jnp.dot(gmat, hw_s[...], preferred_element_type=jnp.float32)
         + jnp.dot(e_ref[...], we_ref[0], preferred_element_type=jnp.float32)
         + b_ref[0])                                               # [tE, 2Fp]

    msg = jax.nn.sigmoid(z[:, :f_pad]) * jax.nn.softplus(z[:, f_pad:])   # [tE, Fp]

    # Pre-transposed scatter one-hot [N, tE]; padded edges (dst = -1) hit no row.
    sub = lax.broadcasted_iota(jnp.int32, (n_pad, tile_e), 0)
    scat = jnp.where(sub == dstr_ref[...], 1.0, 0.0).astype(jnp.bfloat16)

    agg_s[...] += jnp.dot(scat, msg.astype(jnp.bfloat16),
                          preferred_element_type=jnp.float32)      # [N, Fp]

    # ---- layer epilogue: folded eval-BatchNorm + residual ---------------------
    @pl.when(t == n_tiles - 1)
    def _epilogue():
        h_s[...] = h_s[...] + agg_s[...] * scale_ref[0] + shift_ref[0]

    # ---- final: global_mean_pool + Linear(F, 1) -------------------------------
    @pl.when((l == n_layers - 1) & (t == n_tiles - 1))
    def _finalize():
        pooled = jnp.dot(pool_ref[...], h_s[...],
                         preferred_element_type=jnp.float32)       # [G, Fp]
        out_ref[...] = (jnp.dot(pooled, wl_ref[...],
                                preferred_element_type=jnp.float32)
                        + bl_ref[...]).astype(out_ref.dtype)       # [G, 1]


# ----------------------------------------------------------------------------
# Parameter packing: fuse the two gate Linears, split by operand, pad to
# lane-aligned widths, and fold eval-mode BatchNorm into (scale, shift).
# ----------------------------------------------------------------------------
def pack_params(params, feat, edim, f_pad):
    two_f = 2 * f_pad
    wi, wj, we, b, scale, shift = [], [], [], [], [], []

    def gate_w(rf, rs, k_rows):
        w = jnp.zeros((k_rows, two_f), jnp.float32)
        w = w.at[:rf.shape[0], :feat].set(rf)
        w = w.at[:rs.shape[0], f_pad:f_pad + feat].set(rs)
        return w

    for lp in params["layers"]:
        wf, ws = lp["wf"], lp["ws"]                               # [2F+D, F]
        wi.append(gate_w(wf[:feat], ws[:feat], f_pad))
        wj.append(gate_w(wf[feat:2 * feat], ws[feat:2 * feat], f_pad))
        we.append(gate_w(wf[2 * feat:], ws[2 * feat:], edim))
        bb = jnp.zeros((1, two_f), jnp.float32)
        bb = bb.at[:, :feat].set(lp["bf"]).at[:, f_pad:f_pad + feat].set(lp["bs"])
        b.append(bb)
        sc = lp["gamma"] * lax.rsqrt(lp["rvar"] + BN_EPS)          # [1, F]
        sh = lp["beta"] - lp["rmean"] * sc
        scale.append(jnp.zeros((1, f_pad), jnp.float32).at[:, :feat].set(sc))
        shift.append(jnp.zeros((1, f_pad), jnp.float32).at[:, :feat].set(sh))

    wl = jnp.zeros((f_pad, 1), jnp.float32).at[:feat].set(params["wl"])
    return dict(
        wi=jnp.stack(wi).astype(jnp.bfloat16),      # [L, Fp, 2Fp]
        wj=jnp.stack(wj).astype(jnp.bfloat16),      # [L, Fp, 2Fp]
        we=jnp.stack(we).astype(jnp.bfloat16),      # [L, D,  2Fp]
        b=jnp.stack(b),                             # [L, 1, 2Fp] f32
        scale=jnp.stack(scale),                     # [L, 1, Fp]  f32
        shift=jnp.stack(shift),                     # [L, 1, Fp]  f32
        wl=wl, bl=params["bl"])


# ----------------------------------------------------------------------------
# Forward wrapper: one pallas_call, grid = (n_layers, n_edge_tiles)
# ----------------------------------------------------------------------------
def cgc_forward(x, edge_index, edge_attr, batch, params, num_graphs, *,
                edge_tile=128):
    assert edge_tile % 128 == 0, "edge_tile must be a multiple of 128"
    n, feat = x.shape
    n_edges, edim = edge_attr.shape
    n_layers = len(params["layers"])

    f_pad = _round_up(feat, 128)
    two_f = 2 * f_pad
    n_pad = _round_up(n, 16)
    e_pad = _round_up(n_edges, edge_tile)
    n_tiles = e_pad // edge_tile

    packed = pack_params(params, feat, edim, f_pad)

    # Padded node features (pad rows / lanes are zero; BN scale/shift pads are
    # zero so the pad lanes of h stay exactly zero).
    xp = jnp.zeros((n_pad, f_pad), jnp.float32).at[:n, :feat].set(
        x.astype(jnp.float32))

    # Edge indices: PyG convention j = source = edge_index[0], i = target = [1].
    src = edge_index[0].astype(jnp.int32)
    dst = edge_index[1].astype(jnp.int32)
    pad_e = e_pad - n_edges
    if pad_e:
        src = jnp.concatenate([src, jnp.zeros((pad_e,), jnp.int32)])
        dst = jnp.concatenate([dst, jnp.full((pad_e,), -1, jnp.int32)])  # scatter nowhere
        edge_attr = jnp.concatenate(
            [edge_attr, jnp.zeros((pad_e, edim), edge_attr.dtype)], axis=0)
    dst_col = dst.reshape(e_pad, 1)
    src_col = src.reshape(e_pad, 1)
    dst_row = dst.reshape(1, e_pad)
    e_bf = edge_attr.astype(jnp.bfloat16)

    # Mean-pool matrix [G, N_pad] (zero columns for padded nodes).
    memb = jax.nn.one_hot(batch, num_graphs, dtype=jnp.float32)    # [n, G]
    counts = jnp.maximum(memb.sum(axis=0), 1.0)
    pool = jnp.zeros((num_graphs, n_pad), jnp.float32).at[:, :n].set(
        (memb / counts[None, :]).T)

    args = (xp, e_bf, dst_col, src_col, dst_row,
            packed["wi"], packed["wj"], packed["we"], packed["b"],
            packed["scale"], packed["shift"], pool, packed["wl"], packed["bl"])

    in_specs = [
        pl.BlockSpec((n_pad, f_pad), lambda l, t: (0, 0)),          # x
        pl.BlockSpec((edge_tile, edim), lambda l, t: (t, 0)),       # edge_attr
        pl.BlockSpec((edge_tile, 1), lambda l, t: (t, 0)),          # dst (column)
        pl.BlockSpec((edge_tile, 1), lambda l, t: (t, 0)),          # src (column)
        pl.BlockSpec((1, edge_tile), lambda l, t: (0, t)),          # dst (row)
        pl.BlockSpec((1, f_pad, two_f), lambda l, t: (l, 0, 0)),    # Wi
        pl.BlockSpec((1, f_pad, two_f), lambda l, t: (l, 0, 0)),    # Wj
        pl.BlockSpec((1, edim, two_f), lambda l, t: (l, 0, 0)),     # We
        pl.BlockSpec((1, 1, two_f), lambda l, t: (l, 0, 0)),        # bias
        pl.BlockSpec((1, 1, f_pad), lambda l, t: (l, 0, 0)),        # BN scale
        pl.BlockSpec((1, 1, f_pad), lambda l, t: (l, 0, 0)),        # BN shift
        pl.BlockSpec((num_graphs, n_pad), lambda l, t: (0, 0)),     # pool matrix
        pl.BlockSpec((f_pad, 1), lambda l, t: (0, 0)),              # wl
        pl.BlockSpec((1, 1), lambda l, t: (0, 0)),                  # bl
    ]
    out_specs = pl.BlockSpec((num_graphs, 1), lambda l, t: (0, 0))

    scratch_shapes = [
        pltpu.VMEM((n_pad, f_pad), jnp.float32),                    # h (residual)
        pltpu.VMEM((n_pad, f_pad), jnp.float32),                    # agg accumulator
        pltpu.VMEM((2 * n_pad, two_f), jnp.bfloat16),               # [h@Wi ; h@Wj]
    ]

    # Scoped-VMEM limit sized from the actual block footprint (with headroom).
    blk_bytes = (
        3 * n_pad * f_pad * 4                       # x block + h + agg scratch
        + 2 * n_pad * two_f * 2                     # hw scratch (bf16)
        + 2 * edge_tile * (edim * 2 + 3 * 4)        # double-buffered edges + indices
        + 2 * (2 * f_pad + edim) * two_f * 2        # double-buffered Wi/Wj/We
        + 2 * (two_f + 2 * f_pad) * 4               # bias / scale / shift blocks
        + num_graphs * n_pad * 4 + f_pad * 4 + 8 + num_graphs * 4
        + edge_tile * (two_f * 4 + f_pad * 4 + 3 * n_pad * 2))      # live intermediates
    vmem_limit = int(min(56 * 2 ** 20, max(32 * 2 ** 20, 4 * blk_bytes)))

    flops = (n_layers * 4 * n_pad * f_pad * two_f
             + n_layers * e_pad * (4 * n_pad * two_f
                                   + 2 * edim * two_f
                                   + 2 * n_pad * f_pad)
             + 2 * num_graphs * n_pad * f_pad + 2 * num_graphs * f_pad)
    transcendentals = n_layers * e_pad * f_pad * 3
    bytes_accessed = int(sum(int(a.size) * a.dtype.itemsize for a in args)
                         + num_graphs * 4)

    kern = functools.partial(_cgc_fused_kernel, n_pad=n_pad, f_pad=f_pad)
    return pl.pallas_call(
        kern,
        out_shape=jax.ShapeDtypeStruct((num_graphs, 1), jnp.float32),
        grid_spec=pltpu.PrefetchScalarGridSpec(
            num_scalar_prefetch=0,
            grid=(n_layers, n_tiles),
            in_specs=in_specs,
            out_specs=out_specs,
            scratch_shapes=scratch_shapes),
        compiler_params=pltpu.CompilerParams(
            dimension_semantics=("arbitrary", "arbitrary"),
            vmem_limit_bytes=vmem_limit),
        cost_estimate=pl.CostEstimate(flops=int(flops),
                                      transcendentals=int(transcendentals),
                                      bytes_accessed=bytes_accessed),
    )(*args)


# ----------------------------------------------------------------------------
# Pure-JAX f32 reference (mirrors the PyTorch module in eval mode)
# ----------------------------------------------------------------------------
def cgc_reference(x, edge_index, edge_attr, batch, params, num_graphs):
    src, dst = edge_index[0], edge_index[1]
    h = x.astype(jnp.float32)
    ea = edge_attr.astype(jnp.float32)
    for lp in params["layers"]:
        x_i = h[dst]                               # target features
        x_j = h[src]                               # source features
        z = jnp.concatenate([x_i, x_j, ea], axis=1)
        f = jax.nn.sigmoid(z @ lp["wf"] + lp["bf"])
        s = jax.nn.softplus(z @ lp["ws"] + lp["bs"])
        agg = jnp.zeros_like(h).at[dst].add(f * s)
        sc = lp["gamma"] * lax.rsqrt(lp["rvar"] + BN_EPS)
        h = h + (agg - lp["rmean"]) * sc + lp["beta"]
    memb = jax.nn.one_hot(batch, num_graphs, dtype=jnp.float32)
    counts = jnp.maximum(memb.sum(axis=0), 1.0)
    pooled = (memb.T @ h) / counts[:, None]
    return pooled @ params["wl"] + params["bl"]


# ----------------------------------------------------------------------------
# Deterministic parameter init (mirrors the PyTorch module's shapes)
# ----------------------------------------------------------------------------
def init_params(key, feat, edim, n_layers):
    zdim = 2 * feat + edim
    layers = []
    for _ in range(n_layers):
        key, kf, kbf, ks, kbs, kg, kb = jax.random.split(key, 7)
        bound = 1.0 / jnp.sqrt(zdim)
        layers.append(dict(
            wf=jax.random.uniform(kf, (zdim, feat), jnp.float32, -bound, bound),
            bf=jax.random.uniform(kbf, (1, feat), jnp.float32, -bound, bound),
            ws=jax.random.uniform(ks, (zdim, feat), jnp.float32, -bound, bound),
            bs=jax.random.uniform(kbs, (1, feat), jnp.float32, -bound, bound),
            gamma=1.0 + 0.1 * jax.random.normal(kg, (1, feat), jnp.float32),
            beta=0.1 * jax.random.normal(kb, (1, feat), jnp.float32),
            rmean=jnp.zeros((1, feat), jnp.float32),
            rvar=jnp.ones((1, feat), jnp.float32),
        ))
    key, kw, kb2 = jax.random.split(key, 3)
    bound = 1.0 / jnp.sqrt(feat)
    wl = jax.random.uniform(kw, (feat, 1), jnp.float32, -bound, bound)
    bl = jax.random.uniform(kb2, (1, 1), jnp.float32, -bound, bound)
    return dict(layers=layers, wl=wl, bl=bl)


# ----------------------------------------------------------------------------
# Demo
# ----------------------------------------------------------------------------
if __name__ == "__main__":
    model_params = {
        "MODEL_FEAT_SIZE": 32,
        "MODEL_EDGE_DIM": 8,
        "MODEL_NUM_LAYERS": 3,
        "MODEL_DROPOUT_RATE": 0.2,   # identity at inference
    }
    FEAT = model_params["MODEL_FEAT_SIZE"]
    EDIM = model_params["MODEL_EDGE_DIM"]
    NLAY = model_params["MODEL_NUM_LAYERS"]

    N_NODES, N_EDGES, N_GRAPHS = 32, 200, 2    # 200 edges -> 2 edge tiles of 128

    key = jax.random.PRNGKey(0)
    key, kx, ke, ksrc, kdst, kp = jax.random.split(key, 6)

    x = jax.random.normal(kx, (N_NODES, FEAT), jnp.float32)
    edge_attr = jax.random.normal(ke, (N_EDGES, EDIM), jnp.float32)
    edge_index = jnp.stack([
        jax.random.randint(ksrc, (N_EDGES,), 0, N_NODES),
        jax.random.randint(kdst, (N_EDGES,), 0, N_NODES),
    ], axis=0)                                   # [2, E]
    batch = jnp.concatenate([
        jnp.zeros((N_NODES // 2,), jnp.int32),
        jnp.ones((N_NODES - N_NODES // 2,), jnp.int32),
    ])                                           # [N]

    params = init_params(kp, FEAT, EDIM, NLAY)

    out = cgc_forward(x, edge_index, edge_attr, batch, params, N_GRAPHS,
                      edge_tile=128)
    out = jax.block_until_ready(out)

    assert out.shape == (N_GRAPHS, 1)
    assert bool(jnp.all(jnp.isfinite(out)))

    ref = cgc_reference(x, edge_index, edge_attr, batch, params, N_GRAPHS)
    err = float(jnp.max(jnp.abs(out - ref)))
    # bf16 MXU operands vs. an f32 reference, 3 residual layers of growth.
    tol = 1.0 + 3e-2 * float(jnp.max(jnp.abs(ref)))
    assert err <= tol, f"kernel/reference mismatch: err={err} tol={tol}\n{out}\n{ref}"

    print("KERNEL_OK")
</pallas_src>

<mosaic_0001>
module attributes {stable_mosaic.version = 11 : i64} {
  func.func @_cgc_fused_kernel(%arg0: i32, %arg1: i32, %arg2: memref<32x128xf32, #tpu.memory_space<vmem>>, %arg3: memref<128x8xbf16, #tpu.memory_space<vmem>>, %arg4: memref<128x1xi32, #tpu.memory_space<vmem>>, %arg5: memref<128x1xi32, #tpu.memory_space<vmem>>, %arg6: memref<1x128xi32, #tpu.memory_space<vmem>>, %arg7: memref<1x128x256xbf16, #tpu.memory_space<vmem>>, %arg8: memref<1x128x256xbf16, #tpu.memory_space<vmem>>, %arg9: memref<1x8x256xbf16, #tpu.memory_space<vmem>>, %arg10: memref<1x1x256xf32, #tpu.memory_space<vmem>>, %arg11: memref<1x1x128xf32, #tpu.memory_space<vmem>>, %arg12: memref<1x1x128xf32, #tpu.memory_space<vmem>>, %arg13: memref<2x32xf32, #tpu.memory_space<vmem>>, %arg14: memref<128x1xf32, #tpu.memory_space<vmem>>, %arg15: memref<1x1xf32, #tpu.memory_space<vmem>>, %arg16: memref<2x1xf32, #tpu.memory_space<vmem>>, %arg17: memref<32x128xf32, #tpu.memory_space<vmem>>, %arg18: memref<32x128xf32, #tpu.memory_space<vmem>>, %arg19: memref<64x256xbf16, #tpu.memory_space<vmem>>) attributes {dimension_semantics = [#tpu.dimension_semantics<arbitrary>, #tpu.dimension_semantics<arbitrary>], iteration_bounds = array<i64: 3, 2>, scalar_prefetch = 0 : i64, scratch_operands = 3 : i64, tpu.core_type = #tpu.core_type<tc>, window_params = [{pipeline_mode = #tpu.pipeline_mode<synchronous>, transform_indices = @transform_0, window_bounds = array<i64: 32, 128>}, {transform_indices = @transform_1, window_bounds = array<i64: 128, 8>}, {transform_indices = @transform_2, window_bounds = array<i64: 128, 1>}, {transform_indices = @transform_3, window_bounds = array<i64: 128, 1>}, {transform_indices = @transform_4, window_bounds = array<i64: 1, 128>}, {transform_indices = @transform_5, window_bounds = array<i64: 1, 128, 256>}, {transform_indices = @transform_6, window_bounds = array<i64: 1, 128, 256>}, {transform_indices = @transform_7, window_bounds = array<i64: 1, 8, 256>}, {transform_indices = @transform_8, window_bounds = array<i64: 1, 1, 256>}, {transform_indices = @transform_9, window_bounds = array<i64: 1, 1, 128>}, {transform_indices = @transform_10, window_bounds = array<i64: 1, 1, 128>}, {pipeline_mode = #tpu.pipeline_mode<synchronous>, transform_indices = @transform_11, window_bounds = array<i64: 2, 32>}, {pipeline_mode = #tpu.pipeline_mode<synchronous>, transform_indices = @transform_12, window_bounds = array<i64: 128, 1>}, {pipeline_mode = #tpu.pipeline_mode<synchronous>, transform_indices = @transform_13, window_bounds = array<i64: 1, 1>}, {pipeline_mode = #tpu.pipeline_mode<synchronous>, transform_indices = @transform_14, window_bounds = array<i64: 2, 1>}]} {
    %c0_i32 = arith.constant 0 : i32
    %0 = arith.cmpi eq, %arg1, %c0_i32 : i32
    %1 = arith.extui %0 : i1 to i32
    %c0_i32_0 = arith.constant 0 : i32
    %2 = arith.cmpi ne, %1, %c0_i32_0 : i32
    scf.if %2 {
      %c0_i32_32 = arith.constant 0 : i32
      %71 = arith.cmpi eq, %arg0, %c0_i32_32 : i32
      %72 = arith.extui %71 : i1 to i32
      %c0_i32_33 = arith.constant 0 : i32
      %73 = arith.cmpi ne, %72, %c0_i32_33 : i32
      scf.if %73 {
        %c0_50 = arith.constant 0 : index
        %c0_51 = arith.constant 0 : index
        %88 = vector.load %arg2[%c0_50, %c0_51] : memref<32x128xf32, #tpu.memory_space<vmem>>, vector<32x128xf32>
        %c0_52 = arith.constant 0 : index
        %c0_53 = arith.constant 0 : index
        %89 = vector.load %arg17[%c0_52, %c0_53] : memref<32x128xf32, #tpu.memory_space<vmem>>, vector<32x128xf32>
        tpu.vector_store %arg17[%c0_52, %c0_53], %88 {strides = array<i32>} : memref<32x128xf32, #tpu.memory_space<vmem>>, vector<32x128xf32>,
      } else {
      }
      %c0_34 = arith.constant 0 : index
      %c0_35 = arith.constant 0 : index
      %74 = vector.load %arg17[%c0_34, %c0_35] : memref<32x128xf32, #tpu.memory_space<vmem>>, vector<32x128xf32>
      %75 = arith.truncf %74 : vector<32x128xf32> to vector<32x128xbf16>
      %c0_36 = arith.constant 0 : index
      %c0_37 = arith.constant 0 : index
      %c0_38 = arith.constant 0 : index
      %76 = vector.load %arg7[%c0_36, %c0_37, %c0_38] : memref<1x128x256xbf16, #tpu.memory_space<vmem>>, vector<1x128x256xbf16>
      %77 = vector.shape_cast %76 : vector<1x128x256xbf16> to vector<128x256xbf16>
      %cst_39 = arith.constant dense<0.000000e+00> : vector<32x256xf32>
      %78 = tpu.matmul %75, %77, %cst_39 {dimension_numbers = #tpu.dot_dimension_numbers<[1], [0], [0], [1], [0, 0, 1, 1], [], []>} : vector<32x128xbf16>, vector<128x256xbf16>, vector<32x256xf32> -> vector<32x256xf32>
      %79 = arith.truncf %78 : vector<32x256xf32> to vector<32x256xbf16>
      %c0_40 = arith.constant 0 : index
      %c0_41 = arith.constant 0 : index
      %80 = vector.load %arg19[%c0_40, %c0_41] : memref<64x256xbf16, #tpu.memory_space<vmem>>, vector<32x256xbf16>
      tpu.vector_store %arg19[%c0_40, %c0_41], %79 {strides = array<i32>} : memref<64x256xbf16, #tpu.memory_space<vmem>>, vector<32x256xbf16>,
      %c0_42 = arith.constant 0 : index
      %c0_43 = arith.constant 0 : index
      %c0_44 = arith.constant 0 : index
      %81 = vector.load %arg8[%c0_42, %c0_43, %c0_44] : memref<1x128x256xbf16, #tpu.memory_space<vmem>>, vector<1x128x256xbf16>
      %82 = vector.shape_cast %81 : vector<1x128x256xbf16> to vector<128x256xbf16>
      %cst_45 = arith.constant dense<0.000000e+00> : vector<32x256xf32>
      %83 = tpu.matmul %75, %82, %cst_45 {dimension_numbers = #tpu.dot_dimension_numbers<[1], [0], [0], [1], [0, 0, 1, 1], [], []>} : vector<32x128xbf16>, vector<128x256xbf16>, vector<32x256xf32> -> vector<32x256xf32>
      %84 = arith.truncf %83 : vector<32x256xf32> to vector<32x256xbf16>
      %c32 = arith.constant 32 : index
      %c0_46 = arith.constant 0 : index
      %85 = vector.load %arg19[%c32, %c0_46] : memref<64x256xbf16, #tpu.memory_space<vmem>>, vector<32x256xbf16>
      tpu.vector_store %arg19[%c32, %c0_46], %84 {strides = array<i32>} : memref<64x256xbf16, #tpu.memory_space<vmem>>, vector<32x256xbf16>,
      %cst_47 = arith.constant 0.000000e+00 : f32
      %86 = vector.broadcast %cst_47 : f32 to vector<32x128xf32>
      %c0_48 = arith.constant 0 : index
      %c0_49 = arith.constant 0 : index
      %87 = vector.load %arg18[%c0_48, %c0_49] : memref<32x128xf32, #tpu.memory_space<vmem>>, vector<32x128xf32>
      tpu.vector_store %arg18[%c0_48, %c0_49], %86 {strides = array<i32>} : memref<32x128xf32, #tpu.memory_space<vmem>>, vector<32x128xf32>,
    } else {
    }
    %c0 = arith.constant 0 : index
    %c0_1 = arith.constant 0 : index
    %3 = vector.load %arg4[%c0, %c0_1] : memref<128x1xi32, #tpu.memory_space<vmem>>, vector<128x1xi32>
    %c0_2 = arith.constant 0 : index
    %c0_3 = arith.constant 0 : index
    %4 = vector.load %arg5[%c0_2, %c0_3] : memref<128x1xi32, #tpu.memory_space<vmem>>, vector<128x1xi32>
    %5 = tpu.iota {dimensions = array<i32: 1>} : vector<128x64xi32>
    %6 = vector.broadcast %3 : vector<128x1xi32> to vector<128x64xi32>
    %7 = arith.cmpi eq, %5, %6 : vector<128x64xi32>
    %c32_i32 = arith.constant 32 : i32
    %8 = vector.broadcast %c32_i32 : i32 to vector<128x1xi32>
    %9 = arith.addi %4, %8 : vector<128x1xi32>
    %10 = vector.broadcast %9 : vector<128x1xi32> to vector<128x64xi32>
    %11 = arith.cmpi eq, %5, %10 : vector<128x64xi32>
    %12 = arith.ori %7, %11 : vector<128x64xi1>
    %cst = arith.constant 1.000000e+00 : f32
    %cst_4 = arith.constant 0.000000e+00 : f32
    %13 = vector.broadcast %cst : f32 to vector<128x64xf32>
    %14 = vector.broadcast %cst_4 : f32 to vector<128x64xf32>
    %15 = arith.select %12, %13, %14 : vector<128x64xi1>, vector<128x64xf32>
    %16 = arith.truncf %15 : vector<128x64xf32> to vector<128x64xbf16>
    %c0_5 = arith.constant 0 : index
    %c0_6 = arith.constant 0 : index
    %17 = vector.load %arg19[%c0_5, %c0_6] : memref<64x256xbf16, #tpu.memory_space<vmem>>, vector<64x256xbf16>
    %cst_7 = arith.constant dense<0.000000e+00> : vector<128x256xf32>
    %18 = tpu.matmul %16, %17, %cst_7 {dimension_numbers = #tpu.dot_dimension_numbers<[1], [0], [0], [1], [0, 0, 1, 1], [], []>} : vector<128x64xbf16>, vector<64x256xbf16>, vector<128x256xf32> -> vector<128x256xf32>
    %c0_8 = arith.constant 0 : index
    %c0_9 = arith.constant 0 : index
    %19 = vector.load %arg3[%c0_8, %c0_9] : memref<128x8xbf16, #tpu.memory_space<vmem>>, vector<128x8xbf16>
    %c0_10 = arith.constant 0 : index
    %c0_11 = arith.constant 0 : index
    %c0_12 = arith.constant 0 : index
    %20 = vector.load %arg9[%c0_10, %c0_11, %c0_12] : memref<1x8x256xbf16, #tpu.memory_space<vmem>>, vector<1x8x256xbf16>
    %21 = vector.shape_cast %20 : vector<1x8x256xbf16> to vector<8x256xbf16>
    %cst_13 = arith.constant dense<0.000000e+00> : vector<128x256xf32>
    %22 = tpu.matmul %19, %21, %cst_13 {dimension_numbers = #tpu.dot_dimension_numbers<[1], [0], [0], [1], [0, 0, 1, 1], [], []>} : vector<128x8xbf16>, vector<8x256xbf16>, vector<128x256xf32> -> vector<128x256xf32>
    %23 = arith.addf %18, %22 : vector<128x256xf32>
    %c0_14 = arith.constant 0 : index
    %c0_15 = arith.constant 0 : index
    %c0_16 = arith.constant 0 : index
    %24 = vector.load %arg10[%c0_14, %c0_15, %c0_16] : memref<1x1x256xf32, #tpu.memory_space<vmem>>, vector<1x1x256xf32>
    %25 = vector.shape_cast %24 : vector<1x1x256xf32> to vector<1x256xf32>
    %26 = vector.broadcast %25 : vector<1x256xf32> to vector<128x256xf32>
    %27 = arith.addf %23, %26 : vector<128x256xf32>
    %28 = vector.extract_strided_slice %27 {offsets = [0, 0], sizes = [128, 128], strides = [1, 1]} : vector<128x256xf32> to vector<128x128xf32>
    %29 = arith.negf %28 : vector<128x128xf32>
    %30 = math.exp %29 : vector<128x128xf32>
    %cst_17 = arith.constant 1.000000e+00 : f32
    %31 = vector.broadcast %cst_17 : f32 to vector<128x128xf32>
    %32 = arith.addf %31, %30 : vector<128x128xf32>
    %33 = arith.divf %31, %32 : vector<128x128xf32>
    %34 = vector.extract_strided_slice %27 {offsets = [0, 128], sizes = [128, 128], strides = [1, 1]} : vector<128x256xf32> to vector<128x128xf32>
    %cst_18 = arith.constant 0.000000e+00 : f32
    %35 = vector.broadcast %cst_18 : f32 to vector<128x128xf32>
    %36 = arith.maximumf %34, %35 : vector<128x128xf32>
    %37 = vector.broadcast %cst_18 : f32 to vector<128x128xf32>
    %38 = arith.subf %34, %37 : vector<128x128xf32>
    %39 = arith.cmpf one, %38, %38 : vector<128x128xf32>
    %40 = vector.broadcast %cst_18 : f32 to vector<128x128xf32>
    %41 = arith.addf %34, %40 : vector<128x128xf32>
    %42 = math.absf %38 : vector<128x128xf32>
    %cst_19 = arith.constant 0.000000e+00 : f32
    %43 = vector.broadcast %cst_19 : f32 to vector<128x128xf32>
    %44 = arith.subf %43, %42 : vector<128x128xf32>
    %45 = math.exp %44 : vector<128x128xf32>
    %46 = math.log1p %45 : vector<128x128xf32>
    %47 = arith.addf %36, %46 : vector<128x128xf32>
    %48 = arith.select %39, %41, %47 : vector<128x128xi1>, vector<128x128xf32>
    %49 = arith.mulf %33, %48 : vector<128x128xf32>
    %50 = tpu.iota {dimensions = array<i32: 0>} : vector<32x128xi32>
    %c0_20 = arith.constant 0 : index
    %c0_21 = arith.constant 0 : index
    %51 = vector.load %arg6[%c0_20, %c0_21] : memref<1x128xi32, #tpu.memory_space<vmem>>, vector<1x128xi32>
    %52 = vector.broadcast %51 : vector<1x128xi32> to vector<32x128xi32>
    %53 = arith.cmpi eq, %50, %52 : vector<32x128xi32>
    %cst_22 = arith.constant 1.000000e+00 : f32
    %cst_23 = arith.constant 0.000000e+00 : f32
    %54 = vector.broadcast %cst_22 : f32 to vector<32x128xf32>
    %55 = vector.broadcast %cst_23 : f32 to vector<32x128xf32>
    %56 = arith.select %53, %54, %55 : vector<32x128xi1>, vector<32x128xf32>
    %57 = arith.truncf %56 : vector<32x128xf32> to vector<32x128xbf16>
    %c0_24 = arith.constant 0 : index
    %c0_25 = arith.constant 0 : index
    %58 = vector.load %arg18[%c0_24, %c0_25] : memref<32x128xf32, #tpu.memory_space<vmem>>, vector<32x128xf32>
    %59 = arith.truncf %49 : vector<128x128xf32> to vector<128x128xbf16>
    %cst_26 = arith.constant dense<0.000000e+00> : vector<32x128xf32>
    %60 = tpu.matmul %57, %59, %cst_26 {dimension_numbers = #tpu.dot_dimension_numbers<[1], [0], [0], [1], [0, 0, 1, 1], [], []>} : vector<32x128xbf16>, vector<128x128xbf16>, vector<32x128xf32> -> vector<32x128xf32>
    %61 = arith.addf %58, %60 : vector<32x128xf32>
    %c0_27 = arith.constant 0 : index
    %c0_28 = arith.constant 0 : index
    %62 = vector.load %arg18[%c0_27, %c0_28] : memref<32x128xf32, #tpu.memory_space<vmem>>, vector<32x128xf32>
    tpu.vector_store %arg18[%c0_27, %c0_28], %61 {strides = array<i32>} : memref<32x128xf32, #tpu.memory_space<vmem>>, vector<32x128xf32>,
    %c1_i32 = arith.constant 1 : i32
    %63 = arith.cmpi eq, %arg1, %c1_i32 : i32
    %64 = arith.extui %63 : i1 to i32
    %c0_i32_29 = arith.constant 0 : i32
    %65 = arith.cmpi ne, %64, %c0_i32_29 : i32
    scf.if %65 {
      %c0_32 = arith.constant 0 : index
      %c0_33 = arith.constant 0 : index
      %71 = vector.load %arg17[%c0_32, %c0_33] : memref<32x128xf32, #tpu.memory_space<vmem>>, vector<32x128xf32>
      %c0_34 = arith.constant 0 : index
      %c0_35 = arith.constant 0 : index
      %72 = vector.load %arg18[%c0_34, %c0_35] : memref<32x128xf32, #tpu.memory_space<vmem>>, vector<32x128xf32>
      %c0_36 = arith.constant 0 : index
      %c0_37 = arith.constant 0 : index
      %c0_38 = arith.constant 0 : index
      %73 = vector.load %arg11[%c0_36, %c0_37, %c0_38] : memref<1x1x128xf32, #tpu.memory_space<vmem>>, vector<1x1x128xf32>
      %74 = vector.shape_cast %73 : vector<1x1x128xf32> to vector<1x128xf32>
      %75 = vector.broadcast %74 : vector<1x128xf32> to vector<32x128xf32>
      %76 = arith.mulf %72, %75 : vector<32x128xf32>
      %77 = arith.addf %71, %76 : vector<32x128xf32>
      %c0_39 = arith.constant 0 : index
      %c0_40 = arith.constant 0 : index
      %c0_41 = arith.constant 0 : index
      %78 = vector.load %arg12[%c0_39, %c0_40, %c0_41] : memref<1x1x128xf32, #tpu.memory_space<vmem>>, vector<1x1x128xf32>
      %79 = vector.shape_cast %78 : vector<1x1x128xf32> to vector<1x128xf32>
      %80 = vector.broadcast %79 : vector<1x128xf32> to vector<32x128xf32>
      %81 = arith.addf %77, %80 : vector<32x128xf32>
      %c0_42 = arith.constant 0 : index
      %c0_43 = arith.constant 0 : index
      %82 = vector.load %arg17[%c0_42, %c0_43] : memref<32x128xf32, #tpu.memory_space<vmem>>, vector<32x128xf32>
      tpu.vector_store %arg17[%c0_42, %c0_43], %81 {strides = array<i32>} : memref<32x128xf32, #tpu.memory_space<vmem>>, vector<32x128xf32>,
    } else {
    }
    %c2_i32 = arith.constant 2 : i32
    %66 = arith.cmpi eq, %arg0, %c2_i32 : i32
    %c1_i32_30 = arith.constant 1 : i32
    %67 = arith.cmpi eq, %arg1, %c1_i32_30 : i32
    %68 = arith.andi %66, %67 : i1
    %69 = arith.extui %68 : i1 to i32
    %c0_i32_31 = arith.constant 0 : i32
    %70 = arith.cmpi ne, %69, %c0_i32_31 : i32
    scf.if %70 {
      %c0_32 = arith.constant 0 : index
      %c0_33 = arith.constant 0 : index
      %71 = vector.load %arg13[%c0_32, %c0_33] : memref<2x32xf32, #tpu.memory_space<vmem>>, vector<2x32xf32>
      %c0_34 = arith.constant 0 : index
      %c0_35 = arith.constant 0 : index
      %72 = vector.load %arg17[%c0_34, %c0_35] : memref<32x128xf32, #tpu.memory_space<vmem>>, vector<32x128xf32>
      %cst_36 = arith.constant dense<0.000000e+00> : vector<2x128xf32>
      %73 = tpu.matmul %71, %72, %cst_36 {dimension_numbers = #tpu.dot_dimension_numbers<[1], [0], [0], [1], [0, 0, 1, 1], [], []>} : vector<2x32xf32>, vector<32x128xf32>, vector<2x128xf32> -> vector<2x128xf32>
      %c0_37 = arith.constant 0 : index
      %c0_38 = arith.constant 0 : index
      %74 = vector.load %arg14[%c0_37, %c0_38] : memref<128x1xf32, #tpu.memory_space<vmem>>, vector<128x1xf32>
      %cst_39 = arith.constant dense<0.000000e+00> : vector<2x1xf32>
      %75 = tpu.matmul %73, %74, %cst_39 {dimension_numbers = #tpu.dot_dimension_numbers<[1], [0], [0], [1], [0, 0, 1, 1], [], []>} : vector<2x128xf32>, vector<128x1xf32>, vector<2x1xf32> -> vector<2x1xf32>
      %c0_40 = arith.constant 0 : index
      %c0_41 = arith.constant 0 : index
      %76 = vector.load %arg15[%c0_40, %c0_41] : memref<1x1xf32, #tpu.memory_space<vmem>>, vector<1x1xf32>
      %77 = vector.broadcast %76 : vector<1x1xf32> to vector<2x1xf32>
      %78 = arith.addf %75, %77 : vector<2x1xf32>
      %c0_42 = arith.constant 0 : index
      %c0_43 = arith.constant 0 : index
      %79 = vector.load %arg16[%c0_42, %c0_43] : memref<2x1xf32, #tpu.memory_space<vmem>>, vector<2x1xf32>
      tpu.vector_store %arg16[%c0_42, %c0_43], %78 {strides = array<i32>} : memref<2x1xf32, #tpu.memory_space<vmem>>, vector<2x1xf32>,
    } else {
    }
    return
  }
  func.func @transform_0(%arg0: i32, %arg1: i32) -> (i32, i32) {
    %c0_i32 = arith.constant 0 : i32
    %c0_i32_0 = arith.constant 0 : i32
    %c0_i32_1 = arith.constant 0 : i32
    return %c0_i32, %c0_i32_0 : i32, i32
  }
  func.func @transform_1(%arg0: i32, %arg1: i32) -> (i32, i32) {
    %c0_i32 = arith.constant 0 : i32
    %c0_i32_0 = arith.constant 0 : i32
    return %arg1, %c0_i32 : i32, i32
  }
  func.func @transform_2(%arg0: i32, %arg1: i32) -> (i32, i32) {
    %c0_i32 = arith.constant 0 : i32
    %c0_i32_0 = arith.constant 0 : i32
    return %arg1, %c0_i32 : i32, i32
  }
  func.func @transform_3(%arg0: i32, %arg1: i32) -> (i32, i32) {
    %c0_i32 = arith.constant 0 : i32
    %c0_i32_0 = arith.constant 0 : i32
    return %arg1, %c0_i32 : i32, i32
  }
  func.func @transform_4(%arg0: i32, %arg1: i32) -> (i32, i32) {
    %c0_i32 = arith.constant 0 : i32
    %c0_i32_0 = arith.constant 0 : i32
    return %c0_i32, %arg1 : i32, i32
  }
  func.func @transform_5(%arg0: i32, %arg1: i32) -> (i32, i32, i32) {
    %c0_i32 = arith.constant 0 : i32
    %c0_i32_0 = arith.constant 0 : i32
    %c0_i32_1 = arith.constant 0 : i32
    return %arg0, %c0_i32, %c0_i32_0 : i32, i32, i32
  }
  func.func @transform_6(%arg0: i32, %arg1: i32) -> (i32, i32, i32) {
    %c0_i32 = arith.constant 0 : i32
    %c0_i32_0 = arith.constant 0 : i32
    %c0_i32_1 = arith.constant 0 : i32
    return %arg0, %c0_i32, %c0_i32_0 : i32, i32, i32
  }
  func.func @transform_7(%arg0: i32, %arg1: i32) -> (i32, i32, i32) {
    %c0_i32 = arith.constant 0 : i32
    %c0_i32_0 = arith.constant 0 : i32
    %c0_i32_1 = arith.constant 0 : i32
    return %arg0, %c0_i32, %c0_i32_0 : i32, i32, i32
  }
  func.func @transform_8(%arg0: i32, %arg1: i32) -> (i32, i32, i32) {
    %c0_i32 = arith.constant 0 : i32
    %c0_i32_0 = arith.constant 0 : i32
    %c0_i32_1 = arith.constant 0 : i32
    return %arg0, %c0_i32, %c0_i32_0 : i32, i32, i32
  }
  func.func @transform_9(%arg0: i32, %arg1: i32) -> (i32, i32, i32) {
    %c0_i32 = arith.constant 0 : i32
    %c0_i32_0 = arith.constant 0 : i32
    %c0_i32_1 = arith.constant 0 : i32
    return %arg0, %c0_i32, %c0_i32_0 : i32, i32, i32
  }
  func.func @transform_10(%arg0: i32, %arg1: i32) -> (i32, i32, i32) {
    %c0_i32 = arith.constant 0 : i32
    %c0_i32_0 = arith.constant 0 : i32
    %c0_i32_1 = arith.constant 0 : i32
    return %arg0, %c0_i32, %c0_i32_0 : i32, i32, i32
  }
  func.func @transform_11(%arg0: i32, %arg1: i32) -> (i32, i32) {
    %c0_i32 = arith.constant 0 : i32
    %c0_i32_0 = arith.constant 0 : i32
    %c0_i32_1 = arith.constant 0 : i32
    return %c0_i32, %c0_i32_0 : i32, i32
  }
  func.func @transform_12(%arg0: i32, %arg1: i32) -> (i32, i32) {
    %c0_i32 = arith.constant 0 : i32
    %c0_i32_0 = arith.constant 0 : i32
    %c0_i32_1 = arith.constant 0 : i32
    return %c0_i32, %c0_i32_0 : i32, i32
  }
  func.func @transform_13(%arg0: i32, %arg1: i32) -> (i32, i32) {
    %c0_i32 = arith.constant 0 : i32
    %c0_i32_0 = arith.constant 0 : i32
    %c0_i32_1 = arith.constant 0 : i32
    return %c0_i32, %c0_i32_0 : i32, i32
  }
  func.func @transform_14(%arg0: i32, %arg1: i32) -> (i32, i32) {
    %c0_i32 = arith.constant 0 : i32
    %c0_i32_0 = arith.constant 0 : i32
    %c0_i32_1 = arith.constant 0 : i32
    return %c0_i32, %c0_i32_0 : i32, i32
  }
}

</mosaic_0001>

<bundles_post_ra>
// kernel: tpu_custom_call.1
= control target key start
LH: loop header
LB: loop body
LE: loop exit
PB: predicated region body
PF: predicated region fallthrough
CT: control target
= control target key end

     0   :  { %s4721_s0 = inlined_call_operand.hbm [shape: f32[32,128], index: 0, kind: input, shape index: {}]   ;;  %s4722_s1 = inlined_call_operand.vmem [shape: bf16[256,8], index: 1, kind: input, shape index: {}]   ;;  %s4723_s2 = inlined_call_operand.vmem [shape: s32[256,1], index: 2, kind: input, shape index: {}]   ;;  %s4724_s3 = inlined_call_operand.vmem [shape: s32[256,1], index: 3, kind: input, shape index: {}]   ;;  %s4725_s4 = inlined_call_operand.hbm [shape: s32[1,256], index: 4, kind: input, shape index: {}]   ;;  %s4726_s5 = inlined_call_operand.vmem [shape: bf16[3,128,256], index: 5, kind: input, shape index: {}]   ;;  %s4727_s6 = inlined_call_operand.vmem [shape: bf16[3,128,256], index: 6, kind: input, shape index: {}]   ;;  %s4728_s7 = inlined_call_operand.hbm [shape: bf16[3,8,256], index: 7, kind: input, shape index: {}]   ;;  %s4729_s8 = inlined_call_operand.vmem [shape: f32[3,1,256], index: 8, kind: input, shape index: {}]   ;;  %s4730_s9 = inlined_call_operand.vmem [shape: f32[3,1,128], index: 9, kind: input, shape index: {}]   ;;  %s4731_s10 = inlined_call_operand.vmem [shape: f32[3,1,128], index: 10, kind: input, shape index: {}]   ;;  %s4732_s11 = inlined_call_operand.vmem [shape: f32[2,32], index: 11, kind: input, shape index: {}]   ;;  %s4733_s12 = inlined_call_operand.vmem [shape: f32[128,1], index: 12, kind: input, shape index: {}]   ;;  %s4734_s13 = inlined_call_operand.<no memory space> [shape: f32[1,1], index: 13, kind: input, shape index: {}]   ;;  %s4735_s14 = inlined_call_operand.vmem [shape: f32[2,1], index: 14, kind: output, shape index: {}]  }
   0x1   :  { %4786 = sst [smem:[#allocation49_spill]] %s4721_s0  ;;  %v19_v0 = vstv %s4734_s13 }
   0x2   :  { %4787 = sst [smem:[#allocation50_spill]] %s4722_s1  ;;  %20 = vst [vmem:[#allocation5] sm:$0x1] %v19_v0 }
   0x3   :  { %4788 = sst [smem:[#allocation51_spill]] %s4723_s2 }
   0x4   :  { %4789 = sst [smem:[#allocation52_spill]] %s4724_s3 }
   0x5   :  { %4790 = sst [smem:[#allocation53_spill]] %s4725_s4 }
   0x6   :  { %4791 = sst [smem:[#allocation54_spill]] %s4726_s5 }
   0x7   :  { %4792 = sst [smem:[#allocation55_spill]] %s4727_s6 }
   0x8   :  { %4793 = sst [smem:[#allocation56_spill]] %s4728_s7 }
   0x9   :  { %4794 = sst [smem:[#allocation57_spill]] %s4729_s8 }
   0xa   :  { %4795 = sst [smem:[#allocation58_spill]] %s4730_s9 }
   0xb   :  { %4796 = sst [smem:[#allocation59_spill]] %s4731_s10 }
   0xc   :  { %4797 = sst [smem:[#allocation60_spill]] %s4732_s11 }
   0xd   :  { %4798 = sst [smem:[#allocation61_spill]] %s4733_s12 }
   0xe   :  { %4799 = sst [smem:[#allocation62_spill]] %s4735_s14 }
   0xf   :  { %21 = vsyncpa [#allocation7], 0 }
  0x10   :  { %22 = vsyncpa [#allocation9], 0 }
  0x11   :  { %24 = vsyncpa [#allocation9 + $0x1], 0  ;;  %s3412_s15 = smov 0   ;;  %s3414_s16 = smov 0  }
  0x12   :  { %s3416_s17 = smov 0   ;;  %s3418_s18 = smov 0  }
  0x13   :  { %s3420_s19 = smov 0   ;;  %s3422_s20 = smov 0  }
  0x14   :  { %s3424_s21 = smov 0   ;;  %s3426_s22 = smov 0  }
  0x15   :  { %s3428_s13 = smov 0   ;;  %s3430_s23 = smov 0  }
  0x16   :  { %s3432_s24 = smov 0  }
  0x17 LB: > { %4800 = sst [smem:[#allocation14_spill]] %s3293_s17  ;;  %s4738_s25 = sadd.s32 4294967295, %s3325_s24   ;;  %s3325_s24 = sphi %s3432_s24, %s30_s24   ;;  %s3321_s23 = sphi %s3430_s23, %s4967_s23   ;;  %s3317_s13 = sphi %s3428_s13, %s4966_s13   ;;  %s3313_s22 = sphi %s3426_s22, %s4965_s22   ;;  %s3309_s21 = sphi %s3424_s21, %s4964_s21   ;;  %s3305_s20 = sphi %s3422_s20, %s4963_s20   ;;  %s3301_s19 = sphi %s3420_s19, %s4962_s19   ;;  %s3297_s18 = sphi %s3418_s18, %s4961_s18   ;;  %s3293_s17 = sphi %s3416_s17, %s4960_s17   ;;  %s3289_s16 = sphi %s3414_s16, %s4969_s16   ;;  %s3285_s15 = sphi %s3412_s15, %s4968_s15  }
  0x18   : > { %4801 = sst [smem:[#allocation15_spill]] %s3301_s19  ;;  %s39_s26 = sadd.s32 1, %s3317_s13 }
  0x19   : > { %4802 = sst [smem:[#allocation16_spill]] %s3305_s20  ;;  %p3467_p0 = scmp.ge.s32.totalorder %s39_s26, 2 }
  0x1a   : > { %4803 = sst [smem:[#allocation17_spill]] %s3317_s13  ;;  %s148_s28 = sadd.s32 1, %s3305_s20 }
  0x1b   : > { %4804 = sst [smem:[#allocation18_spill]] %s3321_s23  ;;  %p155_p1 = scmp.ne.s32.totalorder %s3305_s20, %s3301_s19 }
  0x1c   : > { %p156_p2 = scmp.eq.s32.totalorder %s3325_s24, 0  ;;  %s4971_s26 = smov (%p3467_p0, %s39_s26), 0 }
  0x1d   : > { %4806 = sst [smem:[#allocation19_spill]] %s4971_s26  ;;  %p161_p4 = scmp.ne.s32.totalorder %s3301_s19, %s3297_s18 }
  0x1e   : > { %p3481_p3 = por %p156_p2, %p155_p1  ;;  %s145_s30 = ssub.s32 %s3317_s13, %s4971_s26 }
  0x1f   : > { %p3490_p5 = scmp.eq.s32.totalorder %s4738_s25, 0  ;;  %p146_p6 = scmp.eq.s32.totalorder %s145_s30, 0 }
  0x20   : > { %p2905_p8 = scmp.lt.s32.totalorder %s3325_s24, 6  ;;  %s475_s10 = sand.u32 1, %s3325_s24  }
  0x21   : > { %p3496_p7 = por %p3490_p5, %p161_p4  ;;  %s477_s18 = sand.u32 1, %s3305_s20  }
  0x22   : > { %s3501_s12 = scalar_select %p146_p6, %s3305_s20, %s148_s28  }
  0x23   : > { %s4811_s4 = sld [smem:[#allocation53_spill]]  ;;  %s478_s6 = scalar_lea.vmem [#allocation8], %s477_s18 }
  0x24   : > { %4810 = sst [smem:[#allocation20_spill]] %s3501_s12  ;;  %s485_s5 = sshll.u32 %s478_s6, 4  ;;  %s486_s5 = int_to_ptr.vmem [resolvable:$true] %s485_s5 }
  0x25   : > { %p2898_p9 = pnand %p2905_p8, %p3481_p3  ;;  %s3514_s30 = scalar_lea.sflag [#allocation9], %s475_s10 }
  0x26   : > { %p2563_p10 = scmp.ge.s32.totalorder %s3325_s24, 1  ;;  %p412_p11 = scmp.lt.s32.totalorder %s3325_s24, 7 }
  0x27   : > { %s4812_s0 = sld [smem:[#allocation49_spill]]  ;;  %s3328_s10 = smov 128  }
  0x28   : > { %p3522_p12 = pnand %p2563_p10, %p412_p11  ;;  %s3329_s28 = smov 8  }
  0x29   : > { %s481_s25 = scalar_lea.hbm %s4811_s4, %s3317_s13  ;;  %s42_s29 = sadd.s32 1, %s3321_s23 }
  0x2a   : > { %s483_s8 = sshll.u32 %s481_s25, 4  ;;  %p2893_p13 = pneg %p3522_p12  ;;  %s484_s8 = int_to_ptr.hbm [resolvable:$true] %s483_s8 }
  0x2b   : > { %2900 = dma.hbm_to_vmem [thread:$0]  (!%p2898_p9), %s484_s8, 16, %s486_s5, %s3514_s30  }
  0x2c   : > { %s3327_s5 = smov [#allocation6]   ;;  %p2894_p1 = pnand %p2893_p13, %p3490_p5 }
  0x2d   : > { %s423_s6 = sshll.u32 %s4812_s0, 4  ;;  %s425_s8 = sshll.u32 %s3327_s5, 4  ;;  %s424_s6 = int_to_ptr.hbm [resolvable:$true] %s423_s6  ;;  %s426_s8 = int_to_ptr.vmem [resolvable:$true] %s425_s8 }
  0x2e   : > { %2896 = dma.hbm_to_vmem [thread:$0]  (!%p2894_p1), %s424_s6, 512, %s426_s8, [#allocation7], %s3328_s10, %s3328_s10, %s3329_s28  }
  0x2f   : > { %s4973_s29 = smov (!%p3467_p0, %s42_s29), %s3321_s23  ;;  %s226_s18 = sadd.s32 1, %s3293_s17 }
  0x30   : > { %p233_p3 = scmp.ne.s32.totalorder %s3293_s17, %s3289_s16  ;;  %p44_p4 = scmp.ge.s32.totalorder %s4973_s29, 3 }
  0x31   : > { %p239_p6 = scmp.ne.s32.totalorder %s3289_s16, %s3285_s15  ;;  %s510_s25 = sand.u32 1, %s3293_s17  }
  0x32   : > { %p3541_p9 = por %p233_p3, %p156_p2  ;;  %s4975_s29 = smov (%p44_p4, %s4973_s29), 0 }
  0x33   : > { %4815 = sst [smem:[#allocation21_spill]] %s4975_s29  ;;  %p3550_p10 = por %p239_p6, %p3490_p5 }
  0x34   : > { %s2566_s6 = sshll.u32 %s510_s25, 3  ;;  %s223_s5 = ssub.s32 %s3321_s23, %s4975_s29 }
  0x35   : > { %p224_p0 = scmp.eq.s32.totalorder %s223_s5, 0  ;;  %s2833_s15 = sshll.u32 %s3321_s23, 3 }
  0x36   : > { %s4817_s7 = sld [smem:[#allocation56_spill]]  ;;  %s512_s0 = scalar_lea.vmem [#allocation10], %s2566_s6 }
  0x37   : > { %s521_s4 = sshll.u32 %s512_s0, 4  ;;  %p2901_p2 = pnand %p2905_p8, %p3541_p9  ;;  %s522_s4 = int_to_ptr.vmem [resolvable:$true] %s521_s4 }
  0x38   : > { %s3561_s13 = scalar_select %p224_p0, %s3293_s17, %s226_s18  }
  0x3a   : > { %4818 = sst [smem:[#allocation22_spill]] %s3561_s13  ;;  %549 = sbr.rel (%p3522_p12) target bundleno = 1225 (0x4c9), region = 76 }
  0x3c   : > { %s517_s28 = scalar_lea.hbm %s4817_s7, %s2833_s15 }
  0x3d   : > { %s519_s12 = sshll.u32 %s517_s28, 4  ;;  %s520_s12 = int_to_ptr.hbm [resolvable:$true] %s519_s12 }
  0x3e   : > { %2903 = dma.hbm_to_vmem [thread:$0]  (!%p2901_p2), %s520_s12, 128, %s522_s4, %s3514_s30  }
  0x3f   : > { %3272 = dma.done.wait (%p3490_p5), [#allocation7], 512  }
  0x40   : > { %3274 = vsyncadd (%p3490_p5), [#allocation7], 4294966784  ;;  %s4819_s0 = sadd.s32 4294967295, %s3325_s24   ;;  %s558_s25 = sand.u32 1, %s3301_s19  }
  0x41   : > { %s556_s18 = sand.u32 1, %s4819_s0   ;;  %s3577_s9 = scalar_lea.vmem [#allocation8], %s558_s25 }
  0x42   : > { %s557_s6 = scalar_lea.sflag [#allocation9], %s556_s18 }
  0x43   : > { %3276 = dma.done.wait (%p3496_p7), %s557_s6, 16  }
  0x44   : > { %3278 = vsyncadd (%p3496_p7), %s557_s6, 4294967280  ;;  %s567_s4 = sand.u32 1, %s3289_s16  }
  0x45   : > { %s3584_s12 = sshll.u32 %s567_s4, 3 }
  0x46   : > { %3280 = dma.done.wait (%p3550_p10), %s557_s6, 128  }
  0x47   : > { %3282 = vsyncadd (%p3550_p10), %s557_s6, 4294967168  ;;  %s2572_s30 = sshll.u32 %s3309_s21, 4  ;;  %p667_p5 = scmp.lt.s32.totalorder %s3313_s22, 2 }
  0x48   : > { %p650_p8 = scmp.lt.s32.totalorder %s2572_s30, 31  ;;  %s4820_s1 = sld [smem:[#allocation50_spill]] }
  0x49   : > { %s3594_s11 = scalar_select %p667_p5, %s3313_s22, 2 }
  0x4a   : > { %s4977_s30 = smov (!%p650_p8, %s2572_s30), 31  ;;  %s4821_s2 = sld [smem:[#allocation51_spill]] }
  0x4b   : > { %s2834_s26 = sshll.u32 %s3594_s11, 7  ;;  %s2582_s5 = sshll.u32 %s3594_s11, 1 }
  0x4c   : > { %s2573_s15 = sshll.u32 %s4977_s30, 2  ;;  %s2575_s8 = sshll.u32 %s4977_s30, 3 }
  0x4d   : > { %s4822_s3 = sld [smem:[#allocation52_spill]]  ;;  %p2583_p7 = scmp.ne.s32.totalorder %s3309_s21, 0 }
  0x4e   : > { %s3601_s28 = scalar_lea.vmem %s4820_s1, %s2573_s15  ;;  %s4823_s23 = sld [smem:[#allocation54_spill]] }
  0x4f   : > { %s4824_s10 = sld [smem:[#allocation55_spill]]  ;;  %p2584_p11 = scmp.ne.s32.totalorder (!%p2583_p7), %s3313_s22, 0 }
  0x50   : > { %s3606_s25 = scalar_lea.vmem %s4821_s2, %s2575_s8  ;;  %s4825_s0 = sld [smem:[#allocation57_spill]] }
  0x51   : > { %s4826_s6 = sld [smem:[#allocation58_spill]] }
  0x52   : > { %s4827_s17 = sld [smem:[#allocation59_spill]] }
  0x53   : > { %s3611_s14 = scalar_lea.vmem %s4822_s3, %s2575_s8 }
  0x54   : > { %s3616_s20 = scalar_lea.vmem %s4823_s23, %s2834_s26  ;;  %691 = sbr.rel (%p2583_p7) target bundleno = 294 (0x126), region = 92 }
  0x55   : > { %s3621_s15 = scalar_lea.vmem %s4824_s10, %s2834_s26 }
  0x56   : > { %s3626_s18 = scalar_lea.vmem %s4825_s0, %s2582_s5 }
  0x57   : > { %s683_s8 = scalar_lea.vmem %s4826_s6, %s3594_s11 }
  0x58   : > { %s686_s7 = scalar_lea.vmem %s4827_s17, %s3594_s11 }
  0x59   : > { %695 = sbr.rel (%p2584_p11) target bundleno = 99 (0x63), region = 96 }
  0x5e   : > { %v696_v1 = vld [vmem:[#allocation6] sm:$0xff]  ;;  %v697_v2 = vld [vmem:[#allocation6 + $0x8] sm:$0xff]  ;;  %v698_v3 = vld [vmem:[#allocation6 + $0x10] sm:$0xff] }
  0x5f   : > { %700 = vst [vmem:[#allocation2 + $0x10] sm:$0xff] %v696_v1  ;;  %v699_v4 = vld [vmem:[#allocation6 + $0x18] sm:$0xff] }
  0x60   : > { %701 = vst [vmem:[#allocation2] sm:$0xff] %v697_v2 }
  0x61   : > { %702 = vst [vmem:[#allocation2 + $0x18] sm:$0xff] %v698_v3 }
  0x62   : > { %703 = vst [vmem:[#allocation2 + $0x8] sm:$0xff] %v699_v4 }
  0x63 PF: > { %v2643_v5 = vld [vmem:[%s3616_s20 + $0x70] sm:$0xf]  ;;  %v2851_v6 = vld [vmem:[%s3616_s20 + $0x74] sm:$0xf0]  ;;  %v2850_v7 = vld [vmem:[%s3616_s20 + $0x74] sm:$0xf] }
  0x64   : > { %v2644_v8 = vor.u32 %v2851_v6, %v2643_v5  ;;  %v2645_v9 = vld [vmem:[%s3616_s20 + $0x78] sm:$0xf0]  ;;  %v2707_v10 = vld [vmem:[%s3621_s15 + $0x70] sm:$0xf]  ;;  %v2867_v11 = vld [vmem:[%s3621_s15 + $0x74] sm:$0xf0] }
  0x65   : > { %v2648_v12 = vor.u32 %v2850_v7, %v2645_v9  ;;  %v2708_v13 = vor.u32 %v2867_v11, %v2707_v10  ;;  %v2866_v14 = vld [vmem:[%s3621_s15 + $0x74] sm:$0xf]  ;;  %v2709_v15 = vld [vmem:[%s3621_s15 + $0x78] sm:$0xf0]  ;;  %v2635_v16 = vld [vmem:[%s3616_s20 + $0x60] sm:$0xf] }
  0x66   : > { %806 = vmatpush.bf16.msra.mxu0 %v2644_v8  ;;  %v2712_v17 = vor.u32 %v2866_v14, %v2709_v15  ;;  %v2849_v18 = vld [vmem:[%s3616_s20 + $0x64] sm:$0xf0]  ;;  %v2848_v19 = vld [vmem:[%s3616_s20 + $0x64] sm:$0xf]  ;;  %v2637_v20 = vld [vmem:[%s3616_s20 + $0x68] sm:$0xf0] }
  0x67   : > { %825 = vmatpush.bf16.msra.mxu1 %v2648_v12  ;;  %948 = vmatpush.bf16.msra.mxu2 %v2708_v13  ;;  %v2636_v21 = vor.u32 %v2849_v18, %v2635_v16  ;;  %v2640_v22 = vor.u32 %v2848_v19, %v2637_v20  ;;  %v2699_v23 = vld [vmem:[%s3621_s15 + $0x60] sm:$0xf]  ;;  %v2865_v24 = vld [vmem:[%s3621_s15 + $0x64] sm:$0xf0]  ;;  %v2864_v25 = vld [vmem:[%s3621_s15 + $0x64] sm:$0xf] }
  0x68   : > { %967 = vmatpush.bf16.msra.mxu3 %v2712_v17  ;;  %v2700_v26 = vor.u32 %v2865_v24, %v2699_v23  ;;  %v2701_v27 = vld [vmem:[%s3621_s15 + $0x68] sm:$0xf0]  ;;  %v2627_v28 = vld [vmem:[%s3616_s20 + $0x50] sm:$0xf]  ;;  %v2847_v29 = vld [vmem:[%s3616_s20 + $0x54] sm:$0xf0] }
  0x69   : > { %v2704_v30 = vor.u32 %v2864_v25, %v2701_v27  ;;  %v2846_v31 = vld [vmem:[%s3616_s20 + $0x54] sm:$0xf]  ;;  %v2629_v32 = vld [vmem:[%s3616_s20 + $0x58] sm:$0xf0]  ;;  %v2691_v33 = vld [vmem:[%s3621_s15 + $0x50] sm:$0xf]  ;;  %v2628_v34 = vor.u32 %v2847_v29, %v2627_v28 }
  0x6a   : > { %807 = vmatpush.bf16.msra.mxu0 %v2636_v21  ;;  %v2863_v35 = vld [vmem:[%s3621_s15 + $0x54] sm:$0xf0]  ;;  %v2862_v36 = vld [vmem:[%s3621_s15 + $0x54] sm:$0xf]  ;;  %v2693_v37 = vld [vmem:[%s3621_s15 + $0x58] sm:$0xf0]  ;;  %v2632_v38 = vor.u32 %v2846_v31, %v2629_v32 }
  0x6b   : > { %826 = vmatpush.bf16.msra.mxu1 %v2640_v22  ;;  %949 = vmatpush.bf16.msra.mxu2 %v2700_v26  ;;  %v2692_v39 = vor.u32 %v2863_v35, %v2691_v33  ;;  %v2619_v40 = vld [vmem:[%s3616_s20 + $0x40] sm:$0xf]  ;;  %v2845_v41 = vld [vmem:[%s3616_s20 + $0x44] sm:$0xf0]  ;;  %v2844_v42 = vld [vmem:[%s3616_s20 + $0x44] sm:$0xf]  ;;  %v2696_v43 = vor.u32 %v2862_v36, %v2693_v37 }
  0x6c   : > { %968 = vmatpush.bf16.msra.mxu3 %v2704_v30  ;;  %v2621_v44 = vld [vmem:[%s3616_s20 + $0x48] sm:$0xf0]  ;;  %v2683_v45 = vld [vmem:[%s3621_s15 + $0x40] sm:$0xf]  ;;  %v2861_v46 = vld [vmem:[%s3621_s15 + $0x44] sm:$0xf0]  ;;  %v2620_v49 = vor.u32 %v2845_v41, %v2619_v40 }
  0x6d   : > { %v2860_v47 = vld [vmem:[%s3621_s15 + $0x44] sm:$0xf]  ;;  %v2685_v48 = vld [vmem:[%s3621_s15 + $0x48] sm:$0xf0]  ;;  %v2624_v50 = vor.u32 %v2844_v42, %v2621_v44  ;;  %v2684_v51 = vor.u32 %v2861_v46, %v2683_v45  ;;  %v2611_v52 = vld [vmem:[%s3616_s20 + $0x30] sm:$0xf] }
  0x6e   : > { %808 = vmatpush.bf16.msra.mxu0 %v2628_v34  ;;  %v2843_v53 = vld [vmem:[%s3616_s20 + $0x34] sm:$0xf0]  ;;  %v2842_v54 = vld [vmem:[%s3616_s20 + $0x34] sm:$0xf]  ;;  %v2688_v55 = vor.u32 %v2860_v47, %v2685_v48  ;;  %v2613_v56 = vld [vmem:[%s3616_s20 + $0x38] sm:$0xf0] }
  0x6f   : > { %827 = vmatpush.bf16.msra.mxu1 %v2632_v38  ;;  %950 = vmatpush.bf16.msra.mxu2 %v2692_v39  ;;  %v2675_v57 = vld [vmem:[%s3621_s15 + $0x30] sm:$0xf]  ;;  %v2859_v58 = vld [vmem:[%s3621_s15 + $0x34] sm:$0xf0]  ;;  %v2858_v59 = vld [vmem:[%s3621_s15 + $0x34] sm:$0xf]  ;;  %v2612_v61 = vor.u32 %v2843_v53, %v2611_v52  ;;  %v2616_v62 = vor.u32 %v2842_v54, %v2613_v56 }
  0x70   : > { %969 = vmatpush.bf16.msra.mxu3 %v2696_v43  ;;  %v2677_v60 = vld [vmem:[%s3621_s15 + $0x38] sm:$0xf0]  ;;  %v2676_v63 = vor.u32 %v2859_v58, %v2675_v57  ;;  %v2603_v0 = vld [vmem:[%s3616_s20 + $0x20] sm:$0xf]  ;;  %v2841_v1 = vld [vmem:[%s3616_s20 + $0x24] sm:$0xf0] }
  0x71   : > { %v2840_v2 = vld [vmem:[%s3616_s20 + $0x24] sm:$0xf]  ;;  %v2680_v3 = vor.u32 %v2858_v59, %v2677_v60  ;;  %v2605_v4 = vld [vmem:[%s3616_s20 + $0x28] sm:$0xf0]  ;;  %v2667_v5 = vld [vmem:[%s3621_s15 + $0x20] sm:$0xf]  ;;  %v2604_v9 = vor.u32 %v2841_v1, %v2603_v0 }
  0x72   : > { %809 = vmatpush.bf16.msra.mxu0 %v2620_v49  ;;  %v2857_v6 = vld [vmem:[%s3621_s15 + $0x24] sm:$0xf0]  ;;  %v2856_v7 = vld [vmem:[%s3621_s15 + $0x24] sm:$0xf]  ;;  %v2669_v8 = vld [vmem:[%s3621_s15 + $0x28] sm:$0xf0]  ;;  %v2608_v10 = vor.u32 %v2840_v2, %v2605_v4 }
  0x73   : > { %828 = vmatpush.bf16.msra.mxu1 %v2624_v50  ;;  %951 = vmatpush.bf16.msra.mxu2 %v2684_v51  ;;  %v2668_v11 = vor.u32 %v2857_v6, %v2667_v5  ;;  %v2595_v12 = vld [vmem:[%s3616_s20 + $0x10] sm:$0xf]  ;;  %v2839_v13 = vld [vmem:[%s3616_s20 + $0x14] sm:$0xf0]  ;;  %v2838_v14 = vld [vmem:[%s3616_s20 + $0x14] sm:$0xf]  ;;  %v2672_v15 = vor.u32 %v2856_v7, %v2669_v8 }
  0x74   : > { %970 = vmatpush.bf16.msra.mxu3 %v2688_v55  ;;  %v2597_v16 = vld [vmem:[%s3616_s20 + $0x18] sm:$0xf0]  ;;  %v2659_v17 = vld [vmem:[%s3621_s15 + $0x10] sm:$0xf]  ;;  %v2855_v18 = vld [vmem:[%s3621_s15 + $0x14] sm:$0xf0]  ;;  %v2596_v21 = vor.u32 %v2839_v13, %v2595_v12 }
  0x75   : > { %v2854_v19 = vld [vmem:[%s3621_s15 + $0x14] sm:$0xf]  ;;  %v2661_v20 = vld [vmem:[%s3621_s15 + $0x18] sm:$0xf0]  ;;  %v2600_v22 = vor.u32 %v2838_v14, %v2597_v16  ;;  %v2660_v23 = vor.u32 %v2855_v18, %v2659_v17  ;;  %v2587_v24 = vld [vmem:[%s3616_s20] sm:$0xf] }
  0x76   : > { %810 = vmatpush.bf16.msra.mxu0 %v2612_v61  ;;  %v2837_v25 = vld [vmem:[%s3616_s20 + $0x4] sm:$0xf0]  ;;  %v2836_v26 = vld [vmem:[%s3616_s20 + $0x4] sm:$0xf]  ;;  %v2664_v27 = vor.u32 %v2854_v19, %v2661_v20  ;;  %v2589_v28 = vld [vmem:[%s3616_s20 + $0x8] sm:$0xf0] }
  0x77   : > { %829 = vmatpush.bf16.msra.mxu1 %v2616_v62  ;;  %952 = vmatpush.bf16.msra.mxu2 %v2676_v63  ;;  %v2651_v29 = vld [vmem:[%s3621_s15] sm:$0xf]  ;;  %v2853_v30 = vld [vmem:[%s3621_s15 + $0x4] sm:$0xf0]  ;;  %v2852_v31 = vld [vmem:[%s3621_s15 + $0x4] sm:$0xf]  ;;  %v2588_v33 = vor.u32 %v2837_v25, %v2587_v24  ;;  %v2592_v36 = vor.u32 %v2836_v26, %v2589_v28 }
  0x78   : > { %971 = vmatpush.bf16.msra.mxu3 %v2680_v3  ;;  %v2653_v32 = vld [vmem:[%s3621_s15 + $0x8] sm:$0xf0]  ;;  %v704_v34 = vld [vmem:[#allocation2 + $0x10] sm:$0xff]  ;;  %v705_v35 = vld [vmem:[#allocation2] sm:$0xff]  ;;  %v2652_v37 = vor.u32 %v2853_v30, %v2651_v29  ;;  %v3330_v46 = vmov 0.0  }
  0x79   : > { %v2656_v38 = vor.u32 %v2852_v31, %v2653_v32  ;;  %v708_v39 = vpack.c.bf16 %v705_v35, %v704_v34  ;;  %v706_v40 = vld [vmem:[#allocation2 + $0x18] sm:$0xff]  ;;  %v707_v41 = vld [vmem:[#allocation2 + $0x8] sm:$0xff]  ;;  %994 = vst [vmem:[#allocation3] sm:$0xff] %v3330_v46 }
  0x7a   : > { %811 = vmatpush.bf16.msra.mxu0 %v2604_v9  ;;  %v709_v42 = vpack.c.bf16 %v707_v41, %v706_v40  ;;  %995 = vst [vmem:[#allocation3 + $0x18] sm:$0xff] %v3330_v46 }
  0x7b   : > { %830 = vmatpush.bf16.msra.mxu1 %v2608_v10  ;;  %953 = vmatpush.bf16.msra.mxu2 %v2668_v11  ;;  %996 = vst [vmem:[#allocation3 + $0x8] sm:$0xff] %v3330_v46 }
  0x7c   : > { %972 = vmatpush.bf16.msra.mxu3 %v2672_v15  ;;  %997 = vst [vmem:[#allocation3 + $0x10] sm:$0xff] %v3330_v46 }
  0x7e   : > { %812 = vmatpush.bf16.msra.mxu0 %v2596_v21 }
  0x7f   : > { %831 = vmatpush.bf16.msra.mxu1 %v2600_v22  ;;  %954 = vmatpush.bf16.msra.mxu2 %v2660_v23 }
  0x80   : > { %973 = vmatpush.bf16.msra.mxu3 %v2664_v27 }
  0x82   : > { %813 = vmatpush.bf16.msra.mxu0 %v2588_v33 }
  0x83   : > { %832 = vmatpush.bf16.msra.mxu1 %v2592_v36  ;;  %955 = vmatpush.bf16.msra.mxu2 %v2652_v37 }
  0x84   : > { %974 = vmatpush.bf16.msra.mxu3 %v2656_v38 }
  0x85   : > { %814 = vmatmul.bf16.vlgmr.msra.gmra.mxu0 %v708_v39 }
  0x86   : > { %833 = vmatmul.bf16.vlgmr.msra.gmra.mxu1 %v708_v39  ;;  %956 = vmatmul.bf16.vlgmr.msra.gmra.mxu2 %v708_v39 }
  0x87   : > { %975 = vmatmul.bf16.vlgmr.msra.gmra.mxu3 %v708_v39 }
  0x95   : > { %819 = vmatmul.bf16.gmra.mxu0 %v709_v42 }
  0x96   : > { %838 = vmatmul.bf16.gmra.mxu1 %v709_v42  ;;  %961 = vmatmul.bf16.gmra.mxu2 %v709_v42 }
  0x97   : > { %980 = vmatmul.bf16.gmra.mxu3 %v709_v42 }
 0x102   : > { %v815_v43 = vpop.f32.mrf.mxu0 }
 0x103   : > { %v834_v44 = vpop.f32.mrf.mxu1 }
 0x104   : > { %v844_v45 = vpack.c.bf16 %v834_v44, %v815_v43 }
 0x106   : > { %848 = vst [vmem:[#allocation4] sm:$0xff] %v844_v45 }
 0x109   : > { %v957_v47 = vpop.f32.mrf.mxu2 }
 0x10a   : > { %v976_v48 = vpop.f32.mrf.mxu3  ;;  %v817_v49 = vpop.f32.mrf.mxu0 }
 0x10b   : > { %v986_v50 = vpack.c.bf16 %v976_v48, %v957_v47  ;;  %v836_v51 = vpop.f32.mrf.mxu1 }
 0x10c   : > { %v845_v52 = vpack.c.bf16 %v836_v51, %v817_v49 }
 0x10d   : > { %990 = vst [vmem:[#allocation4 + $0x20] sm:$0xff] %v986_v50 }
 0x10e   : > { %849 = vst [vmem:[#allocation4 + $0x8] sm:$0xff] %v845_v52 }
 0x111   : > { %v959_v53 = vpop.f32.mrf.mxu2 }
 0x112   : > { %v978_v54 = vpop.f32.mrf.mxu3  ;;  %v820_v55 = vpop.f32.mrf.mxu0 }
 0x113   : > { %v987_v56 = vpack.c.bf16 %v978_v54, %v959_v53  ;;  %v839_v57 = vpop.f32.mrf.mxu1 }
 0x114   : > { %v846_v58 = vpack.c.bf16 %v839_v57, %v820_v55 }
 0x115   : > { %991 = vst [vmem:[#allocation4 + $0x28] sm:$0xff] %v987_v56 }
 0x116   : > { %850 = vst [vmem:[#allocation4 + $0x10] sm:$0xff] %v846_v58 }
 0x119   : > { %v962_v59 = vpop.f32.mrf.mxu2 }
 0x11a   : > { %v981_v60 = vpop.f32.mrf.mxu3  ;;  %v822_v61 = vpop.f32.mrf.mxu0 }
 0x11b   : > { %v988_v62 = vpack.c.bf16 %v981_v60, %v962_v59  ;;  %v841_v63 = vpop.f32.mrf.mxu1 }
 0x11c   : > { %v847_v0 = vpack.c.bf16 %v841_v63, %v822_v61 }
 0x11d   : > { %992 = vst [vmem:[#allocation4 + $0x30] sm:$0xff] %v988_v62 }
 0x11e   : > { %851 = vst [vmem:[#allocation4 + $0x18] sm:$0xff] %v847_v0 }
 0x121   : > { %v964_v1 = vpop.f32.mrf.mxu2 }
 0x122   : > { %v983_v2 = vpop.f32.mrf.mxu3 }
 0x123   : > { %v989_v3 = vpack.c.bf16 %v983_v2, %v964_v1 }
 0x125   : > { %993 = vst [vmem:[#allocation4 + $0x38] sm:$0xff] %v989_v3 }
 0x126 PF: > { %v1000_v4 = vld [vmem:[%s3606_s25 + $0x10] sm:$0xff]  ;;  %v998_v5 = vld [vmem:[%s3606_s25] sm:$0xff]  ;;  %v3331_v7 = vmov 0   ;;  %v1015_v9 = vld [vmem:[%s3611_s14 + $0x8] sm:$0xff]  ;;  %s4828_s1 = scalar_lea.vmem [#allocation10], %s3584_s12  ;;  %vm1311_vm0 = vcmask 1043456  }
 0x127   : > { %v1014_v6 = vld [vmem:[%s3611_s14] sm:$0xff]  ;;  %3004 = vset.pattern.permute.xlu2 %v3331_v7  ;;  %3002 = vset.pattern.permute.xlu0 %v3331_v7  ;;  %v1001_v10 = vld [vmem:[%s3606_s25 + $0x18] sm:$0xff]  ;;  %v1097_v11 = vadd.s32 32, %v1015_v9  ;;  %v999_v12 = vld [vmem:[%s3606_s25 + $0x8] sm:$0xff]  ;;  %vm1286_vm1 = vcmask 64512   ;;  %vm1456_vm8 = vcmask 523264  }
 0x128   : > { %v1096_v8 = vadd.s32 32, %v1014_v6  ;;  %3003 = vset.pattern.permute.xlu1 %v3331_v7  ;;  %1039 = vperm.xlu2 %3004, %v1000_v4   ;;  %v1016_v13 = vld [vmem:[%s3611_s14 + $0x10] sm:$0xff]  ;;  %v1017_v14 = vld [vmem:[%s3611_s14 + $0x18] sm:$0xff]  ;;  %v1002_v15 = vld [vmem:[%s3606_s25 + $0x20] sm:$0xff]  ;;  %p2281_p12 = scmp.eq.s32.totalorder %s3309_s21, 1  ;;  %p2829_p13 = scmp.ne.s32.totalorder %s3309_s21, 1 }
 0x129   : > { %1033 = vperm.xlu0 %3002, %v998_v5   ;;  %v1098_v16 = vadd.s32 32, %v1016_v13  ;;  %v1099_v17 = vadd.s32 32, %v1017_v14  ;;  %v1019_v18 = vld [vmem:[%s3611_s14 + $0x28] sm:$0xff]  ;;  %v1018_v19 = vld [vmem:[%s3611_s14 + $0x20] sm:$0xff]  ;;  %v1020_v23 = vld [vmem:[%s3611_s14 + $0x30] sm:$0xff] }
 0x12a   : > { %1113 = vperm.xlu1 %3003, %v1096_v8   ;;  %v1101_v20 = vadd.s32 32, %v1019_v18  ;;  %v1100_v21 = vadd.s32 32, %v1018_v19  ;;  %v1003_v22 = vld [vmem:[%s3606_s25 + $0x28] sm:$0xff]  ;;  %v1102_v24 = vadd.s32 32, %v1020_v23  ;;  %v1004_v25 = vld [vmem:[%s3606_s25 + $0x30] sm:$0xff]  ;;  %v1005_v26 = vld [vmem:[%s3606_s25 + $0x38] sm:$0xff]  ;;  %v4745_v23 = vlaneseq }
 0x12b   : > { %v1021_v27 = vld [vmem:[%s3611_s14 + $0x38] sm:$0xff]  ;;  %v1007_v28 = vld [vmem:[%s3606_s25 + $0x48] sm:$0xff]  ;;  %v1006_v30 = vld [vmem:[%s3606_s25 + $0x40] sm:$0xff] }
 0x12c   : > { %v1103_v29 = vadd.s32 32, %v1021_v27  ;;  %v1022_v31 = vld [vmem:[%s3611_s14 + $0x40] sm:$0xff]  ;;  %v1023_v32 = vld [vmem:[%s3611_s14 + $0x48] sm:$0xff]  ;;  %v1008_v33 = vld [vmem:[%s3606_s25 + $0x50] sm:$0xff] }
 0x12d   : > { %v1104_v34 = vadd.s32 32, %v1022_v31  ;;  %v1105_v35 = vadd.s32 32, %v1023_v32  ;;  %v1025_v36 = vld [vmem:[%s3611_s14 + $0x58] sm:$0xff]  ;;  %v1024_v37 = vld [vmem:[%s3611_s14 + $0x50] sm:$0xff]  ;;  %v1026_v41 = vld [vmem:[%s3611_s14 + $0x60] sm:$0xff] }
 0x12e   : > { %v1107_v38 = vadd.s32 32, %v1025_v36  ;;  %v1106_v39 = vadd.s32 32, %v1024_v37  ;;  %v1009_v40 = vld [vmem:[%s3606_s25 + $0x58] sm:$0xff]  ;;  %v1108_v42 = vadd.s32 32, %v1026_v41  ;;  %v1010_v43 = vld [vmem:[%s3606_s25 + $0x60] sm:$0xff]  ;;  %v1011_v44 = vld [vmem:[%s3606_s25 + $0x68] sm:$0xff] }
 0x12f   : > { %v1027_v45 = vld [vmem:[%s3611_s14 + $0x68] sm:$0xff]  ;;  %v1013_v46 = vld [vmem:[%s3606_s25 + $0x78] sm:$0xff]  ;;  %v1012_v48 = vld [vmem:[%s3606_s25 + $0x70] sm:$0xff] }
 0x130   : > { %1042 = vperm.xlu2 %3004, %v1001_v10   ;;  %v1109_v47 = vadd.s32 32, %v1027_v45  ;;  %v1240_v49 = vld [vmem:[%s4828_s1] sm:$0xff]  ;;  %v1029_v52 = vld [vmem:[%s3611_s14 + $0x78] sm:$0xff]  ;;  %v2874_v58 = vld [vmem:[#allocation4 + $0x34] sm:$0xf] }
 0x131   : > { %1036 = vperm.xlu0 %3002, %v999_v12   ;;  %v1282_v50 = vunpack.c.l.b16 %v1240_v49  ;;  %v1028_v51 = vld [vmem:[%s3611_s14 + $0x70] sm:$0xff]  ;;  %v3738_v56 = vld [vmem:[%s3601_s28 + $0x38] sm:$0xff]  ;;  %v1111_v60 = vadd.s32 32, %v1029_v52  ;;  %v2779_v0 = vld [vmem:[#allocation4 + $0x20] sm:$0xf]  ;;  %v1283_v12 = vunpack.c.h.b16 %v1240_v49 }
 0x132   : > { %1116 = vperm.xlu1 %3003, %v1097_v11   ;;  %v2787_v54 = vld [vmem:[#allocation4 + $0x30] sm:$0xf]  ;;  %v2875_v57 = vld [vmem:[#allocation4 + $0x34] sm:$0xf0]  ;;  %v1110_v59 = vadd.s32 32, %v1028_v51  ;;  %v2880_v49 = vld [vmem:[%s3601_s28 + $0x20] sm:$0xff] }
 0x133   : > { %v1284_v53 = vpack.c.b16 %v1282_v50, %v1282_v50  ;;  %v2788_v61 = vor.u32 %v2875_v57, %v2787_v54  ;;  %v2789_v62 = vld [vmem:[#allocation4 + $0x38] sm:$0xf0]  ;;  %v2873_v1 = vld [vmem:[#allocation4 + $0x24] sm:$0xf0]  ;;  %v2872_v3 = vld [vmem:[#allocation4 + $0x24] sm:$0xf]  ;;  %v1285_v13 = vpack.c.b16 %v1283_v12, %v1283_v12 }
 0x134   : > { %v2792_v63 = vor.u32 %v2874_v58, %v2789_v62  ;;  %v2780_v2 = vor.u32 %v2873_v1, %v2779_v0  ;;  %v2781_v4 = vld [vmem:[#allocation4 + $0x28] sm:$0xf0]  ;;  %v2771_v6 = vld [vmem:[#allocation4 + $0x10] sm:$0xf]  ;;  %v2871_v7 = vld [vmem:[#allocation4 + $0x14] sm:$0xf0] }
 0x135   : > { %v1313_v55 = vsel %vm1311_vm0, %v1284_v53, 0  ;;  %1485 = vmatpush.bf16.msra.mxu2 %v2788_v61  ;;  %v2784_v5 = vor.u32 %v2872_v3, %v2781_v4  ;;  %v2870_v8 = vld [vmem:[#allocation4 + $0x14] sm:$0xf]  ;;  %v2772_v9 = vor.u32 %v2871_v7, %v2771_v6  ;;  %v2773_v10 = vld [vmem:[#allocation4 + $0x18] sm:$0xf0]  ;;  %v1316_v14 = vsel %vm1311_vm0, %v1285_v13, 0 }
 0x136   : > { %2884 = vmatpush.bf16.msra.mxu1 %v1313_v55  ;;  %1325 = vmatpush.bf16.msra.mxu0 %v1313_v55  ;;  %v2776_v11 = vor.u32 %v2870_v8, %v2773_v10  ;;  %v2868_v18 = vld [vmem:[#allocation4 + $0x4] sm:$0xf]  ;;  %v2765_v19 = vld [vmem:[#allocation4 + $0x8] sm:$0xf0]  ;;  %v2879_v41 = vld [vmem:[%s3601_s28 + $0x18] sm:$0xff] }
 0x137   : > { %1534 = vmatpush.bf16.msra.mxu3 %v2792_v63  ;;  %v2881_v57 = vld [vmem:[%s3601_s28 + $0x28] sm:$0xff] }
 0x138   : > { %1045 = vperm.xlu2 %3004, %v1002_v15   ;;  %v2763_v15 = vld [vmem:[#allocation4] sm:$0xf] }
 0x139   : > { %1119 = vperm.xlu0 %3002, %v1098_v16   ;;  %2752 = vmatmul.msk.bf16.vlgmr.msra.gmra.mxu1 %vm1286_vm1, %v3738_v56  ;;  %v2869_v16 = vld [vmem:[#allocation4 + $0x4] sm:$0xf0] }
 0x13a   : > { %1122 = vperm.xlu1 %3003, %v1099_v17   ;;  %1486 = vmatpush.bf16.msra.mxu2 %v2780_v2  ;;  %v2764_v17 = vor.u32 %v2869_v16, %v2763_v15  ;;  %v2882_v2 = vld [vmem:[%s3601_s28 + $0x30] sm:$0xff] }
 0x13b   : > { %1535 = vmatpush.bf16.msra.mxu3 %v2784_v5  ;;  %1374 = vmatpush.bf16.msrb.mxu1 %v1316_v14 }
 0x13e   : > { %1487 = vmatpush.bf16.msra.mxu2 %v2772_v9 }
 0x13f   : > { %1536 = vmatpush.bf16.msra.mxu3 %v2776_v11 }
 0x140   : > { %1128 = vperm.xlu2 %3004, %v1101_v20   ;;  %v2768_v20 = vor.u32 %v2868_v18, %v2765_v19 }
 0x141   : > { %1048 = vperm.xlu0 %3002, %v1003_v22   ;;  %v2877_v22 = vld [vmem:[%s3601_s28 + $0x8] sm:$0xff] }
 0x142   : > { %1125 = vperm.xlu1 %3003, %v1100_v21   ;;  %v2876_v21 = vld [vmem:[%s3601_s28] sm:$0xff]  ;;  %1488 = vmatpush.bf16.msra.mxu2 %v2764_v17 }
 0x143   : > { %1537 = vmatpush.bf16.msra.mxu3 %v2768_v20  ;;  %2745 = vmatmul.msk.bf16.vlgmr.msra.gmra.mxu0 %vm1286_vm1, %v2876_v21 }
 0x148   : > { %1131 = vperm.xlu2 %3004, %v1102_v24  }
 0x149   : > { %1051 = vperm.xlu0 %3002, %v1004_v25   ;;  %2753 = vmatmul.msk.bf16.vlgmr.msrb.gmra.mxu1 %vm1286_vm1, %v2876_v21 }
 0x14a   : > { %1054 = vperm.xlu1 %3003, %v1005_v26   ;;  %v3750_v26 = vand.u32 127, %v4745_v23 }
 0x150   : > { %1060 = vperm.xlu2 %3004, %v1007_v28  }
 0x151   : > { %1134 = vperm.xlu0 %3002, %v1103_v29  }
 0x152   : > { %1057 = vperm.xlu1 %3003, %v1006_v30   ;;  %v3332_v30 = vmov 0.0  }
 0x153   : > { %2746 = vmatmul.msk.bf16.gmra.mxu0 %vm1286_vm1, %v2877_v22 }
 0x158   : > { %1063 = vperm.xlu2 %3004, %v1008_v33   ;;  %v2878_v33 = vld [vmem:[%s3601_s28 + $0x10] sm:$0xff] }
 0x159   : > { %1137 = vperm.xlu0 %3002, %v1104_v34   ;;  %2754 = vmatmul.msk.bf16.gmra.mxu1 %vm1286_vm1, %v2877_v22 }
 0x15a   : > { %1140 = vperm.xlu1 %3003, %v1105_v35  }
 0x160   : > { %1146 = vperm.xlu2 %3004, %v1107_v38  }
 0x161   : > { %1066 = vperm.xlu0 %3002, %v1009_v40  }
 0x162   : > { %1143 = vperm.xlu1 %3003, %v1106_v39  }
 0x163   : > { %2747 = vmatmul.msk.bf16.gmra.mxu0 %vm1286_vm1, %v2878_v33 }
 0x168   : > { %1149 = vperm.xlu2 %3004, %v1108_v42  }
 0x169   : > { %1069 = vperm.xlu0 %3002, %v1010_v43   ;;  %2755 = vmatmul.msk.bf16.gmra.mxu1 %vm1286_vm1, %v2878_v33 }
 0x16a   : > { %1072 = vperm.xlu1 %3003, %v1011_v44  }
 0x170   : > { %1078 = vperm.xlu2 %3004, %v1013_v46  }
 0x171   : > { %1152 = vperm.xlu0 %3002, %v1109_v47  }
 0x172   : > { %1075 = vperm.xlu1 %3003, %v1012_v48  }
 0x173   : > { %2748 = vmatmul.msk.bf16.gmra.mxu0 %vm1286_vm1, %v2879_v41 }
 0x179   : > { %1155 = vperm.xlu0 %3002, %v1110_v59   ;;  %2756 = vmatmul.msk.bf16.gmra.mxu1 %vm1286_vm1, %v2879_v41 }
 0x17a   : > { %1158 = vperm.xlu1 %3003, %v1111_v60  }
 0x182   : > { %v1040_v27 = vpop.permute.xlu2 %1039 }
 0x183   : > { %vm1082_vm9 = vcmp.eq.s32.totalorder %v3750_v26, %v1040_v27  ;;  %2749 = vmatmul.msk.bf16.gmra.mxu0 %vm1286_vm1, %v2880_v49 }
 0x189   : > { %2757 = vmatmul.msk.bf16.gmra.mxu1 %vm1286_vm1, %v2880_v49 }
 0x18a   : > { %v1043_v35 = vpop.permute.xlu2 %1042 }
 0x18b   : > { %vm1083_vm11 = vcmp.eq.s32.totalorder %v3750_v26, %v1043_v35 }
 0x192   : > { %v1046_v38 = vpop.permute.xlu2 %1045 }
 0x193   : > { %2750 = vmatmul.msk.bf16.gmra.mxu0 %vm1286_vm1, %v2881_v57 }
 0x199   : > { %2758 = vmatmul.msk.bf16.gmra.mxu1 %vm1286_vm1, %v2881_v57 }
 0x19a   : > { %v1129_v45 = vpop.permute.xlu2 %1128 }
 0x19b   : > { %v1034_v24 = vpop.permute.xlu0 %1033 }
 0x19c   : > { %v1114_v25 = vpop.permute.xlu1 %1113  ;;  %vm1080_vm2 = vcmp.eq.s32.totalorder %v3750_v26, %v1034_v24 }
 0x19d   : > { %vm1160_vm3 = vcmp.eq.s32.totalorder %v3750_v26, %v1114_v25 }
 0x19e   : > { %vm1176_vm4 = vmor %vm1080_vm2, %vm1160_vm3  ;;  %vm1165_vm2 = vcmp.eq.s32.totalorder %v3750_v26, %v1129_v45  ;;  %vm1084_vm3 = vcmp.eq.s32.totalorder %v3750_v26, %v1046_v38 }
 0x19f   : > { %v1192_v31 = vsel %vm1176_vm4, 1.0, %v3332_v30 }
 0x1a2   : > { %v1132_v53 = vpop.permute.xlu2 %1131 }
 0x1a3   : > { %v1037_v28 = vpop.permute.xlu0 %1036  ;;  %2751 = vmatmul.msk.bf16.gmra.mxu0 %vm1286_vm1, %v2882_v2 }
 0x1a4   : > { %v1117_v29 = vpop.permute.xlu1 %1116  ;;  %vm1081_vm5 = vcmp.eq.s32.totalorder %v3750_v26, %v1037_v28 }
 0x1a5   : > { %vm1161_vm6 = vcmp.eq.s32.totalorder %v3750_v26, %v1117_v29 }
 0x1a6   : > { %vm1177_vm7 = vmor %vm1081_vm5, %vm1161_vm6 }
 0x1a7   : > { %v1193_v32 = vsel %vm1177_vm7, 1.0, %v3332_v30 }
 0x1a8   : > { %v1208_v34 = vpack.c.bf16 %v1193_v32, %v1192_v31 }
 0x1a9   : > { %2759 = vmatmul.msk.bf16.gmra.mxu1 %vm1286_vm1, %v2882_v2 }
 0x1aa   : > { %2793 = vmatmul.msk.bf16.vlgmr.msra.gmra.mxu2 %vm1456_vm8, %v1208_v34  ;;  %2801 = vmatmul.msk.bf16.vlgmr.msra.gmra.mxu3 %vm1456_vm8, %v1208_v34  ;;  %v1061_v60 = vpop.permute.xlu2 %1060 }
 0x1ab   : > { %v1120_v36 = vpop.permute.xlu0 %1119 }
 0x1ac   : > { %v1123_v37 = vpop.permute.xlu1 %1122  ;;  %vm1162_vm10 = vcmp.eq.s32.totalorder %v3750_v26, %v1120_v36 }
 0x1ad   : > { %vm1163_vm12 = vcmp.eq.s32.totalorder %v3750_v26, %v1123_v37  ;;  %vm1178_vm13 = vmor %vm1082_vm9, %vm1162_vm10 }
 0x1ae   : > { %vm1179_vm14 = vmor %vm1083_vm11, %vm1163_vm12  ;;  %v1194_v39 = vsel %vm1178_vm13, 1.0, %v3332_v30  ;;  %vm1166_vm11 = vcmp.eq.s32.totalorder %v3750_v26, %v1132_v53 }
 0x1af   : > { %v1195_v40 = vsel %vm1179_vm14, 1.0, %v3332_v30 }
 0x1b0   : > { %v1209_v42 = vpack.c.bf16 %v1195_v40, %v1194_v39 }
 0x1b2   : > { %v1064_v63 = vpop.permute.xlu2 %1063 }
 0x1b3   : > { %v1049_v43 = vpop.permute.xlu0 %1048 }
 0x1b4   : > { %v1126_v44 = vpop.permute.xlu1 %1125  ;;  %vm1085_vm15 = vcmp.eq.s32.totalorder %v3750_v26, %v1049_v43 }
 0x1b5   : > { %vm1164_vm0 = vcmp.eq.s32.totalorder %v3750_v26, %v1126_v44  ;;  %vm1181_vm4 = vmor %vm1085_vm15, %vm1165_vm2 }
 0x1b6   : > { %vm1180_vm5 = vmor %vm1084_vm3, %vm1164_vm0  ;;  %v1197_v47 = vsel %vm1181_vm4, 1.0, %v3332_v30  ;;  %vm1089_vm0 = vcmp.eq.s32.totalorder %v3750_v26, %v1061_v60  ;;  %v3817_v12 = vpop.f32.mrf.mxu1 }
 0x1b7   : > { %v1196_v48 = vsel %vm1180_vm5, 1.0, %v3332_v30 }
 0x1b8   : > { %v1210_v50 = vpack.c.bf16 %v1197_v47, %v1196_v48 }
 0x1b9   : > { %2760 = vmatmul.msk.bf16.gmra.mxu1 %vm1286_vm1, %v3738_v56 }
 0x1ba   : > { %2794 = vmatmul.msk.bf16.gmra.mxu2 %vm1456_vm8, %v1209_v42  ;;  %2802 = vmatmul.msk.bf16.gmra.mxu3 %vm1456_vm8, %v1209_v42  ;;  %v1147_v6 = vpop.permute.xlu2 %1146 }
 0x1bb   : > { %v1052_v46 = vpop.permute.xlu0 %1051 }
 0x1bc   : > { %v1055_v51 = vpop.permute.xlu1 %1054  ;;  %vm1086_vm7 = vcmp.eq.s32.totalorder %v3750_v26, %v1052_v46 }
 0x1bd   : > { %vm1087_vm9 = vcmp.eq.s32.totalorder %v3750_v26, %v1055_v51  ;;  %vm1182_vm12 = vmor %vm1086_vm7, %vm1166_vm11  ;;  %vm1090_vm7 = vcmp.eq.s32.totalorder %v3750_v26, %v1064_v63 }
 0x1be   : > { %v1198_v58 = vsel %vm1182_vm12, 1.0, %v3332_v30  ;;  %v3823_v56 = vpop.f32.mrf.mxu1 }
 0x1c0   : > { %v1327_v24 = vpop.f32.mrf.mxu0 }
 0x1c2   : > { %v1150_v14 = vpop.permute.xlu2 %1149 }
 0x1c3   : > { %v1135_v52 = vpop.permute.xlu0 %1134 }
 0x1c4   : > { %vm1167_vm6 = vcmp.eq.s32.totalorder %v3750_v26, %v1135_v52  ;;  %v1058_v54 = vpop.permute.xlu1 %1057 }
 0x1c5   : > { %vm1183_vm10 = vmor %vm1087_vm9, %vm1167_vm6  ;;  %vm1088_vm15 = vcmp.eq.s32.totalorder %v3750_v26, %v1058_v54  ;;  %vm1171_vm6 = vcmp.eq.s32.totalorder %v3750_v26, %v1147_v6 }
 0x1c6   : > { %v1199_v55 = vsel %vm1183_vm10, 1.0, %v3332_v30  ;;  %v1376_v22 = vpop.f32.mrf.mxu1 }
 0x1c7   : > { %v1211_v59 = vpack.c.bf16 %v1199_v55, %v1198_v58 }
 0x1c8   : > { %v1329_v31 = vpop.f32.mrf.mxu0 }
 0x1ca   : > { %2795 = vmatmul.msk.bf16.gmra.mxu2 %vm1456_vm8, %v1210_v50  ;;  %2803 = vmatmul.msk.bf16.gmra.mxu3 %vm1456_vm8, %v1210_v50  ;;  %v1079_v21 = vpop.permute.xlu2 %1078 }
 0x1cb   : > { %v1138_v61 = vpop.permute.xlu0 %1137 }
 0x1cc   : > { %v1141_v62 = vpop.permute.xlu1 %1140  ;;  %vm1168_vm13 = vcmp.eq.s32.totalorder %v3750_v26, %v1138_v61 }
 0x1cd   : > { %vm1169_vm14 = vcmp.eq.s32.totalorder %v3750_v26, %v1141_v62  ;;  %vm1184_vm2 = vmor %vm1088_vm15, %vm1168_vm13  ;;  %vm1172_vm15 = vcmp.eq.s32.totalorder %v3750_v26, %v1150_v14 }
 0x1ce   : > { %vm1185_vm3 = vmor %vm1089_vm0, %vm1169_vm14  ;;  %v1200_v0 = vsel %vm1184_vm2, 1.0, %v3332_v30  ;;  %v1378_v29 = vpop.f32.mrf.mxu1 }
 0x1cf   : > { %v1201_v1 = vsel %vm1185_vm3, 1.0, %v3332_v30 }
 0x1d0   : > { %v1212_v3 = vpack.c.bf16 %v1201_v1, %v1200_v0  ;;  %v1332_v33 = vpop.f32.mrf.mxu0 }
 0x1d3   : > { %v1067_v4 = vpop.permute.xlu0 %1066 }
 0x1d4   : > { %v1144_v5 = vpop.permute.xlu1 %1143  ;;  %vm1091_vm4 = vcmp.eq.s32.totalorder %v3750_v26, %v1067_v4 }
 0x1d5   : > { %vm1170_vm5 = vcmp.eq.s32.totalorder %v3750_v26, %v1144_v5  ;;  %vm1187_vm9 = vmor %vm1091_vm4, %vm1171_vm6  ;;  %vm1095_vm4 = vcmp.eq.s32.totalorder %v3750_v26, %v1079_v21 }
 0x1d6   : > { %vm1186_vm10 = vmor %vm1090_vm7, %vm1170_vm5  ;;  %v1203_v8 = vsel %vm1187_vm9, 1.0, %v3332_v30  ;;  %v1381_v32 = vpop.f32.mrf.mxu1 }
 0x1d7   : > { %v1202_v9 = vsel %vm1186_vm10, 1.0, %v3332_v30 }
 0x1d8   : > { %v1213_v10 = vpack.c.bf16 %v1203_v8, %v1202_v9  ;;  %v1334_v38 = vpop.f32.mrf.mxu0 }
 0x1da   : > { %2796 = vmatmul.msk.bf16.gmra.mxu2 %vm1456_vm8, %v1211_v59  ;;  %2804 = vmatmul.msk.bf16.gmra.mxu3 %vm1456_vm8, %v1211_v59 }
 0x1db   : > { %v1070_v7 = vpop.permute.xlu0 %1069 }
 0x1dc   : > { %v1073_v11 = vpop.permute.xlu1 %1072  ;;  %vm1092_vm12 = vcmp.eq.s32.totalorder %v3750_v26, %v1070_v7 }
 0x1dd   : > { %vm1093_vm13 = vcmp.eq.s32.totalorder %v3750_v26, %v1073_v11  ;;  %vm1188_vm0 = vmor %vm1092_vm12, %vm1172_vm15 }
 0x1de   : > { %v1204_v17 = vsel %vm1188_vm0, 1.0, %v3332_v30  ;;  %v1383_v34 = vpop.f32.mrf.mxu1 }
 0x1e0   : > { %v1337_v43 = vpop.f32.mrf.mxu0 }
 0x1e3   : > { %v1153_v13 = vpop.permute.xlu0 %1152 }
 0x1e4   : > { %vm1173_vm11 = vcmp.eq.s32.totalorder %v3750_v26, %v1153_v13  ;;  %v1076_v15 = vpop.permute.xlu1 %1075 }
 0x1e5   : > { %vm1189_vm14 = vmor %vm1093_vm13, %vm1173_vm11  ;;  %vm1094_vm3 = vcmp.eq.s32.totalorder %v3750_v26, %v1076_v15 }
 0x1e6   : > { %v1205_v16 = vsel %vm1189_vm14, 1.0, %v3332_v30 }
 0x1e7   : > { %v1214_v18 = vpack.c.bf16 %v1205_v16, %v1204_v17 }
 0x1e8   : > { %v1339_v49 = vpop.f32.mrf.mxu0 }
 0x1ea   : > { %2797 = vmatmul.msk.bf16.gmra.mxu2 %vm1456_vm8, %v1212_v3  ;;  %2805 = vmatmul.msk.bf16.gmra.mxu3 %vm1456_vm8, %v1212_v3  ;;  %v1579_v3 = vld [vmem:[%s3626_s18] sm:$0x3] }
 0x1eb   : > { %v1156_v19 = vpop.permute.xlu0 %1155  ;;  %v3840_v4 = vperm.slane %v1579_v3, 0  ;;  %v3845_v13 = vperm.slane %v1579_v3, 1 }
 0x1ec   : > { %v1159_v20 = vpop.permute.xlu1 %1158  ;;  %vm1174_vm1 = vcmp.eq.s32.totalorder %v3750_v26, %v1156_v19 }
 0x1ed   : > { %vm1175_vm2 = vcmp.eq.s32.totalorder %v3750_v26, %v1159_v20  ;;  %vm1190_vm5 = vmor %vm1094_vm3, %vm1174_vm1 }
 0x1ee   : > { %vm1191_vm6 = vmor %vm1095_vm4, %vm1175_vm2  ;;  %v1206_v25 = vsel %vm1190_vm5, 1.0, %v3332_v30 }
 0x1ef   : > { %v1207_v27 = vsel %vm1191_vm6, 1.0, %v3332_v30  ;;  %v1386_v30 = vpop.f32.mrf.mxu1 }
 0x1f0   : > { %v1215_v28 = vpack.c.bf16 %v1207_v27, %v1206_v25  ;;  %v1342_v55 = vpop.f32.mrf.mxu0 }
 0x1f7   : > { %v1388_v48 = vpop.f32.mrf.mxu1 }
 0x1f8   : > { %v1344_v2 = vpop.f32.mrf.mxu0 }
 0x1fa   : > { %2798 = vmatmul.msk.bf16.gmra.mxu2 %vm1456_vm8, %v1213_v10  ;;  %2806 = vmatmul.msk.bf16.gmra.mxu3 %vm1456_vm8, %v1213_v10 }
 0x1ff   : > { %v1391_v54 = vpop.f32.mrf.mxu1 }
 0x200   : > { %v1347_v10 = vpop.f32.mrf.mxu0 }
 0x207   : > { %v1393_v61 = vpop.f32.mrf.mxu1 }
 0x20a   : > { %2799 = vmatmul.msk.bf16.gmra.mxu2 %vm1456_vm8, %v1214_v18  ;;  %2807 = vmatmul.msk.bf16.gmra.mxu3 %vm1456_vm8, %v1214_v18 }
 0x20f   : > { %v1396_v9 = vpop.f32.mrf.mxu1 }
 0x21a   : > { %2800 = vmatmul.msk.bf16.gmra.mxu2 %vm1456_vm8, %v1215_v28  ;;  %2808 = vmatmul.msk.bf16.gmra.mxu3 %vm1456_vm8, %v1215_v28  ;;  %v1349_v28 = vpop.f32.mrf.mxu0 }
 0x22d   : > { %v1490_v35 = vpop.f32.mrf.mxu2  ;;  %v1539_v36 = vpop.f32.mrf.mxu3 }
 0x22e   : > { %v1491_v37 = vadd.f32 %v1490_v35, %v1327_v24  ;;  %v1540_v26 = vadd.f32 %v1539_v36, %v1376_v22  ;;  %v3856_v22 = vpop.f32.mrf.mxu1 }
 0x230   : > { %v1585_v11 = vadd.f32 %v3840_v4, %v1491_v37  ;;  %v3848_v15 = vadd.f32 %v3845_v13, %v1540_v26 }
 0x232   : > { %v2809_v14 = vmul.f32 -1.442695, %v1585_v11  ;;  %4829 = vst [vmem:[#allocation23_spill] sm:$0xff] %v3848_v15  ;;  %v1969_v24 = vand.u32 2147483647, %v3848_v15 }
 0x234   : > { %3006 = vpow2.f32 %v2809_v14 }
 0x235   : > { %v1492_v39 = vpop.f32.mrf.mxu2  ;;  %v1541_v40 = vpop.f32.mrf.mxu3 }
 0x236   : > { %v1493_v41 = vadd.f32 %v1492_v39, %v1329_v31  ;;  %v1542_v42 = vadd.f32 %v1541_v40, %v1378_v29  ;;  %v1985_v31 = vsub.f32 0.0, %v1969_v24 }
 0x238   : > { %v1587_v16 = vadd.f32 %v3840_v4, %v1493_v41  ;;  %v3854_v21 = vadd.f32 %v3845_v13, %v1542_v42  ;;  %v2001_v41 = vmul.f32 1.442695, %v1985_v31 }
 0x23a   : > { %4830 = vst [vmem:[#allocation24_spill] sm:$0xff] %v3854_v21  ;;  %v2810_v25 = vmul.f32 -1.442695, %v1587_v16  ;;  %v1970_v29 = vand.u32 2147483647, %v3854_v21  ;;  %v3007_v26 = vpop.eup %3006 }
 0x23c   : > { %3008 = vpow2.f32 %v2810_v25 }
 0x23d   : > { %v1495_v44 = vpop.f32.mrf.mxu2  ;;  %v1544_v45 = vpop.f32.mrf.mxu3 }
 0x23e   : > { %v1496_v46 = vadd.f32 %v1495_v44, %v1332_v33  ;;  %v1545_v47 = vadd.f32 %v1544_v45, %v1381_v32  ;;  %v1401_v45 = vpop.f32.mrf.mxu1 }
 0x240   : > { %v1589_v27 = vadd.f32 %v3840_v4, %v1496_v46  ;;  %v3862_v33 = vadd.f32 %v3845_v13, %v1545_v47 }
 0x242   : > { %v2811_v32 = vmul.f32 -1.442695, %v1589_v27  ;;  %4831 = vst [vmem:[#allocation25_spill] sm:$0xff] %v3862_v33  ;;  %v1971_v42 = vand.u32 2147483647, %v3862_v33  ;;  %v3009_v46 = vpop.eup %3008 }
 0x244   : > { %3010 = vpow2.f32 %v2811_v32 }
 0x245   : > { %v1497_v50 = vpop.f32.mrf.mxu2  ;;  %v1546_v51 = vpop.f32.mrf.mxu3 }
 0x246   : > { %v1498_v52 = vadd.f32 %v1497_v50, %v1334_v38  ;;  %v1547_v53 = vadd.f32 %v1546_v51, %v1383_v34  ;;  %v1986_v38 = vsub.f32 0.0, %v1970_v29  ;;  %v1352_v51 = vpop.f32.mrf.mxu0 }
 0x248   : > { %v1591_v39 = vadd.f32 %v3840_v4, %v1498_v52  ;;  %v2003_v47 = vmul.f32 1.442695, %v1986_v38  ;;  %v1987_v52 = vsub.f32 0.0, %v1971_v42 }
 0x24d   : > { %v1500_v57 = vpop.f32.mrf.mxu2  ;;  %v1549_v58 = vpop.f32.mrf.mxu3 }
 0x24e   : > { %v1501_v59 = vadd.f32 %v1500_v57, %v1337_v43  ;;  %v1550_v60 = vadd.f32 %v1549_v58, %v1386_v30  ;;  %v3870_v30 = vadd.f32 %v3845_v13, %v1547_v53  ;;  %v3872_v43 = vadd.f32 1.0, %v3007_v26  ;;  %v1354_v26 = vpop.f32.mrf.mxu0 }
 0x24f   : > { %v3881_v58 = vadd.f32 1.0, %v3009_v46 }
 0x250   : > { %4832 = vst [vmem:[#allocation26_spill] sm:$0xff] %v3870_v30  ;;  %v3878_v53 = vadd.f32 %v3845_v13, %v1550_v60 }
 0x251   : > { %4833 = vst [vmem:[#allocation27_spill] sm:$0xff] %v3872_v43 }
 0x252   : > { %4834 = vst [vmem:[#allocation28_spill] sm:$0xff] %v3878_v53  ;;  %v1973_v3 = vand.u32 2147483647, %v3878_v53 }
 0x253   : > { %4835 = vst [vmem:[#allocation29_spill] sm:$0xff] %v3881_v58 }
 0x254   : > { %v1989_v25 = vsub.f32 0.0, %v1973_v3 }
 0x255   : > { %v1502_v62 = vpop.f32.mrf.mxu2  ;;  %v1551_v63 = vpop.f32.mrf.mxu3 }
 0x256   : > { %v1503_v0 = vadd.f32 %v1502_v62, %v1339_v49  ;;  %v3837_v1 = vadd.f32 %v1551_v63, %v1388_v48  ;;  %v1593_v48 = vadd.f32 %v3840_v4, %v1501_v59  ;;  %v2812_v49 = vmul.f32 -1.442695, %v1591_v39 }
 0x258   : > { %v1595_v50 = vadd.f32 %v3840_v4, %v1503_v0  ;;  %v2813_v59 = vmul.f32 -1.442695, %v1593_v48  ;;  %v2005_v0 = vmul.f32 1.442695, %v1987_v52  ;;  %v3887_v60 = vadd.f32 %v3845_v13, %v3837_v1 }
 0x25a   : > { %v2814_v63 = vmul.f32 -1.442695, %v1595_v50  ;;  %4836 = vst [vmem:[#allocation30_spill] sm:$0xff] %v3887_v60  ;;  %v1974_v27 = vand.u32 2147483647, %v3887_v60 }
 0x25d   : > { %v1505_v5 = vpop.f32.mrf.mxu2  ;;  %v1554_v6 = vpop.f32.mrf.mxu3 }
 0x25e   : > { %v1506_v7 = vadd.f32 %v1505_v5, %v1342_v55  ;;  %v3842_v8 = vadd.f32 %v1554_v6, %v1391_v54  ;;  %v1972_v54 = vand.u32 2147483647, %v3870_v30 }
 0x260   : > { %v1597_v62 = vadd.f32 %v3840_v4, %v1506_v7  ;;  %v3896_v11 = vadd.f32 %v3845_v13, %v3842_v8 }
 0x262   : > { %v2815_v7 = vmul.f32 -1.442695, %v1597_v62  ;;  %4839 = vst [vmem:[#allocation33_spill] sm:$0xff] %v3896_v11 }
 0x265   : > { %v1507_v17 = vpop.f32.mrf.mxu2  ;;  %v1556_v18 = vpop.f32.mrf.mxu3 }
 0x266   : > { %v1508_v19 = vadd.f32 %v1507_v17, %v1344_v2  ;;  %v3851_v20 = vadd.f32 %v1556_v18, %v1393_v61  ;;  %v3011_v61 = vpop.eup %3010  ;;  %v1988_v2 = vsub.f32 0.0, %v1972_v54  ;;  %v1403_v17 = vpop.f32.mrf.mxu1 }
 0x267   : > { %v3890_v6 = vadd.f32 1.0, %v3011_v61 }
 0x268   : > { %v1599_v14 = vadd.f32 %v3840_v4, %v1508_v19  ;;  %v2007_v24 = vmul.f32 1.442695, %v1988_v2 }
 0x269   : > { %4837 = vst [vmem:[#allocation31_spill] sm:$0xff] %v3890_v6 }
 0x26d   : > { %v1510_v34 = vpop.f32.mrf.mxu2  ;;  %v1559_v35 = vpop.f32.mrf.mxu3 }
 0x26e   : > { %v1511_v36 = vadd.f32 %v1510_v34, %v1347_v10  ;;  %v3864_v37 = vadd.f32 %v1559_v35, %v1396_v9  ;;  %v1975_v34 = vand.u32 2147483647, %v3896_v11  ;;  %v2816_v35 = vmul.f32 -1.442695, %v1599_v14 }
 0x270   : > { %v1601_v40 = vadd.f32 %v3840_v4, %v1511_v36  ;;  %v3911_v36 = vadd.f32 %v3845_v13, %v3851_v20  ;;  %v3924_v20 = vadd.f32 %v3845_v13, %v3864_v37 }
 0x272   : > { %v2817_v44 = vmul.f32 -1.442695, %v1601_v40  ;;  %4842 = vst [vmem:[#allocation36_spill] sm:$0xff] %v3911_v36  ;;  %v1976_v52 = vand.u32 2147483647, %v3911_v36 }
 0x274   : > { %3012 = vpow2.f32 %v2817_v44  ;;  %v2009_v44 = vmul.f32 1.442695, %v1989_v25 }
 0x275   : > { %3014 = vpow2.f32 %v2001_v41  ;;  %v1512_v55 = vpop.f32.mrf.mxu2  ;;  %v1561_v57 = vpop.f32.mrf.mxu3 }
 0x276   : > { %3016 = vrcp.f32 %v3872_v43  ;;  %v1513_v9 = vadd.f32 %v1512_v55, %v1349_v28  ;;  %v1562_v54 = vadd.f32 %v1561_v57, %v3856_v22  ;;  %v1406_v22 = vpop.f32.mrf.mxu1 }
 0x277   : > { %3018 = vpow2.f32 %v2003_v47 }
 0x278   : > { %3020 = vpow2.f32 %v2812_v49  ;;  %v1603_v8 = vadd.f32 %v3840_v4, %v1513_v9  ;;  %v3944_v25 = vadd.f32 %v3845_v13, %v1562_v54 }
 0x279   : > { %3022 = vrcp.f32 %v3881_v58 }
 0x27a   : > { %v3013_v5 = vpop.eup %3012  ;;  %3024 = vpow2.f32 %v2813_v59  ;;  %v2818_v47 = vmul.f32 -1.442695, %v1603_v8  ;;  %v1357_v8 = vpop.f32.mrf.mxu0 }
 0x27b   : > { %v3892_v10 = vpop.eup %3014  ;;  %3026 = vpow2.f32 %v2814_v63  ;;  %v3901_v1 = vadd.f32 1.0, %v3013_v5  ;;  %v1977_v5 = vand.u32 2147483647, %v3924_v20 }
 0x27c   : > { %4838 = vst [vmem:[#allocation32_spill] sm:$0xff] %v3892_v10  ;;  %v3899_v16 = vpop.eup %3016  ;;  %3028 = vpow2.f32 %v2005_v0 }
 0x27d   : > { %4840 = vst [vmem:[#allocation34_spill] sm:$0xff] %v3899_v16  ;;  %v3903_v18 = vpop.eup %3018  ;;  %v1515_v28 = vpop.f32.mrf.mxu2  ;;  %3030 = vrcp.f32 %v3890_v6  ;;  %vm1806_vm8 = vweird.f32 %v3901_v1 }
 0x27e   : > { %4841 = vst [vmem:[#allocation35_spill] sm:$0xff] %v3903_v18  ;;  %v1564_v29 = vpop.f32.mrf.mxu3  ;;  %v3021_v31 = vpop.eup %3020  ;;  %v1516_v19 = vadd.f32 %v1515_v28, %v1352_v51  ;;  %3032 = vpow2.f32 %v2815_v7  ;;  %v1991_v51 = vsub.f32 0.0, %v1975_v34  ;;  %v1993_v34 = vsub.f32 0.0, %v1977_v5 }
 0x27f   : > { %v1565_v32 = vadd.f32 %v1564_v29, %v1401_v45  ;;  %v3913_v38 = vpop.eup %3022  ;;  %3034 = vrcp.f32 %v3901_v1  ;;  %v3920_v42 = vadd.f32 1.0, %v3021_v31  ;;  %v1990_v45 = vsub.f32 0.0, %v1974_v27 }
 0x280   : > { %4843 = vst [vmem:[#allocation37_spill] sm:$0xff] %v3913_v38  ;;  %v1605_v39 = vadd.f32 %v3840_v4, %v1516_v19  ;;  %v3025_v41 = vpop.eup %3024  ;;  %3036 = vpow2.f32 %v2007_v24  ;;  %v2013_v14 = vmul.f32 1.442695, %v1991_v51  ;;  %v1992_v24 = vsub.f32 0.0, %v1976_v52 }
 0x281   : > { %v3918_v40 = vadd.f32 %v3845_v13, %v1565_v32  ;;  %4844 = vst [vmem:[#allocation38_spill] sm:$0xff] %v3920_v42  ;;  %v3027_v46 = vpop.eup %3026  ;;  %3038 = vpow2.f32 %v2816_v35  ;;  %v3933_v61 = vadd.f32 1.0, %v3025_v41  ;;  %v2011_v62 = vmul.f32 1.442695, %v1990_v45 }
 0x282   : > { %v2819_v48 = vmul.f32 -1.442695, %v1605_v39  ;;  %v3927_v50 = vpop.eup %3028  ;;  %v3936_v37 = vadd.f32 1.0, %v3027_v46  ;;  %v2015_v41 = vmul.f32 1.442695, %v1992_v24 }
 0x283   : > { %v1979_v49 = vand.u32 2147483647, %v3918_v40  ;;  %4845 = vst [vmem:[#allocation39_spill] sm:$0xff] %v3927_v50  ;;  %v3931_v55 = vpop.eup %3030 }
 0x284   : > { %4846 = vst [vmem:[#allocation40_spill] sm:$0xff] %v3931_v55  ;;  %3040 = vpow2.f32 %v2819_v48  ;;  %v3033_v59 = vpop.eup %3032 }
 0x285   : > { %4847 = vst [vmem:[#allocation41_spill] sm:$0xff] %v3933_v61  ;;  %3042 = vrcp.f32 %v3920_v42  ;;  %v1995_v63 = vsub.f32 0.0, %v1979_v49  ;;  %v1517_v0 = vpop.f32.mrf.mxu2  ;;  %v3938_v3 = vpop.eup %3034  ;;  %v3947_v27 = vadd.f32 1.0, %v3033_v59 }
 0x286   : > { %4848 = vst [vmem:[#allocation42_spill] sm:$0xff] %v3936_v37  ;;  %v1566_v2 = vpop.f32.mrf.mxu3  ;;  %3044 = vpow2.f32 %v2818_v47  ;;  %v1518_v57 = vadd.f32 %v1517_v0, %v1354_v26  ;;  %v3941_v7 = vpop.eup %3036  ;;  %v1802_v19 = vmul.f32 %v3938_v3, %v3901_v1  ;;  %vm1807_vm7 = vweird.f32 %v3938_v3 }
 0x287   : > { %v1567_v9 = vadd.f32 %v1566_v2, %v1403_v17  ;;  %4849 = vst [vmem:[#allocation43_spill] sm:$0xff] %v3941_v7  ;;  %3046 = vpow2.f32 %v2009_v44  ;;  %v3039_v31 = vpop.eup %3038  ;;  %v2021_v17 = vmul.f32 1.442695, %v1995_v63  ;;  %v1978_v44 = vand.u32 2147483647, %v3944_v25  ;;  %vm4032_vm10 = vmor %vm1806_vm8, %vm1807_vm7 }
 0x288   : > { %3048 = vrcp.f32 %v3933_v61  ;;  %v1607_v28 = vadd.f32 %v3840_v4, %v1518_v57  ;;  %v3965_v48 = vadd.f32 1.0, %v3039_v31  ;;  %v1803_v54 = vsub.f32 1.0, %v1802_v19 }
 0x289   : > { %v3951_v29 = vadd.f32 %v3845_v13, %v1567_v9  ;;  %3050 = vpow2.f32 %v2011_v62  ;;  %v2017_v62 = vmul.f32 1.442695, %v1993_v34  ;;  %v1994_v9 = vsub.f32 0.0, %v1978_v44 }
 0x28a   : > { %v3041_v32 = vpop.eup %3040  ;;  %3052 = vrcp.f32 %v3936_v37  ;;  %v2820_v35 = vmul.f32 -1.442695, %v1607_v28  ;;  %v1408_v28 = vpop.f32.mrf.mxu1 }
 0x28b   : > { %v1980_v26 = vand.u32 2147483647, %v3951_v29  ;;  %v3957_v39 = vpop.eup %3042  ;;  %3054 = vpow2.f32 %v2013_v14  ;;  %v3961_v46 = vadd.f32 1.0, %v3041_v32  ;;  %v1804_v32 = vmul.f32 %v3938_v3, %v1803_v54 }
 0x28c   : > { %4850 = vst [vmem:[#allocation44_spill] sm:$0xff] %v3957_v39  ;;  %v3045_v45 = vpop.eup %3044  ;;  %3056 = vrcp.f32 %v3947_v27 }
 0x28d   : > { %v3963_v47 = vpop.eup %3046  ;;  %3058 = vpow2.f32 %v2021_v17  ;;  %v1996_v49 = vsub.f32 0.0, %v1980_v26  ;;  %v1520_v51 = vpop.f32.mrf.mxu2  ;;  %v3972_v57 = vadd.f32 1.0, %v3045_v45  ;;  %v1805_v5 = vadd.f32 %v3938_v3, %v1804_v32 }
 0x28e   : > { %4851 = vst [vmem:[#allocation45_spill] sm:$0xff] %v3963_v47  ;;  %v1569_v52 = vpop.f32.mrf.mxu3  ;;  %v3967_v59 = vpop.eup %3048  ;;  %3060 = vpow2.f32 %v2820_v35  ;;  %v1521_v63 = vadd.f32 %v1520_v51, %v1357_v8  ;;  %v2019_v51 = vmul.f32 1.442695, %v1994_v9  ;;  %v1812_v9 = vand.u32 2147483648, %v3901_v1 }
 0x28f   : > { %4852 = vst [vmem:[#allocation46_spill] sm:$0xff] %v3967_v59  ;;  %v1570_v0 = vadd.f32 %v1569_v52, %v1406_v22  ;;  %v3969_v2 = vpop.eup %3050  ;;  %3062 = vpow2.f32 %v2015_v41  ;;  %v2023_v19 = vmul.f32 1.442695, %v1996_v49  ;;  %v1359_v52 = vpop.f32.mrf.mxu0  ;;  %v1810_v49 = vand.u32 2147483647, %v3901_v1 }
 0x290   : > { %4853 = vst [vmem:[#allocation47_spill] sm:$0xff] %v3969_v2  ;;  %v3974_v14 = vpop.eup %3052  ;;  %3064 = vrcp.f32 %v3961_v46  ;;  %v1609_v31 = vadd.f32 %v3840_v4, %v1521_v63  ;;  %v1840_v10 = vand.u32 2147483647, %v3961_v46  ;;  %vm1836_vm11 = vweird.f32 %v3961_v46 }
 0x291   : > { %4854 = vst [vmem:[#allocation48_spill] sm:$0xff] %v3974_v14  ;;  %v3980_v17 = vadd.f32 %v3845_v13, %v1570_v0  ;;  %v3982_v22 = vpop.eup %3054  ;;  %3066 = vrcp.f32 %v3965_v48  ;;  %vm4011_vm9 = vcmp.eq.f32.partialorder %v1810_v49, 8.507059e+37 }
 0x292   : > { %v3987_v34 = vpop.eup %3056  ;;  %3068 = vpow2.f32 %v2017_v62  ;;  %v2821_v26 = vmul.f32 -1.442695, %v1609_v31  ;;  %vm4091_vm14 = vcmp.eq.f32.partialorder %v1840_v10, 8.507059e+37 }
 0x293   : > { %v1981_v41 = vand.u32 2147483647, %v3980_v17  ;;  %v3991_v44 = vpop.eup %3058  ;;  %3070 = vrcp.f32 %v3972_v57  ;;  %vm1949_vm5 = vcmp.ne.f32.partialorder %v3980_v17, %v3980_v17 }
 0x294   : > { %v3061_v63 = vpop.eup %3060  ;;  %3072 = vpow2.f32 %v2821_v26  ;;  %v2123_v26 = vadd.f32 1.0, %v3991_v44 }
 0x295   : > { %v1997_v0 = vsub.f32 0.0, %v1981_v41  ;;  %v3998_v62 = vpop.eup %3062  ;;  %3074 = vpow2.f32 %v2023_v19  ;;  %v1522_v31 = vpop.f32.mrf.mxu2  ;;  %v4008_v45 = vadd.f32 1.0, %v3061_v63  ;;  %v2126_v19 = vmul.f32 -0.5, %v3991_v44 }
 0x296   : > { %v1571_v23 = vpop.f32.mrf.mxu3  ;;  %v4003_v24 = vpop.eup %3064  ;;  %v1523_v8 = vadd.f32 %v1522_v31, %v1359_v52  ;;  %3076 = vpow2.f32 %v2019_v51  ;;  %v1809_v63 = vsel %vm4032_vm10, %v3938_v3, %v1805_v5 }
 0x297   : > { %v2025_v35 = vmul.f32 1.442695, %v1997_v0  ;;  %v1572_v54 = vadd.f32 %v1571_v23, %v1408_v28  ;;  %v4006_v41 = vpop.eup %3066  ;;  %v1842_v28 = vand.u32 2147483648, %v3961_v46  ;;  %v1832_v49 = vmul.f32 %v4003_v24, %v3961_v46  ;;  %v1411_v31 = vpop.f32.mrf.mxu1 }
 0x298   : > { %v4015_v21 = vpop.eup %3068  ;;  %v1611_v0 = vadd.f32 %v3840_v4, %v1523_v8  ;;  %v2127_v30 = vadd.f32 1.0, %v2126_v19  ;;  %v1857_v32 = vand.u32 2147483648, %v4008_v45  ;;  %vm1837_vm12 = vweird.f32 %v4003_v24 }
 0x299   : > { %3078 = vpow2.f32 %v2025_v35  ;;  %v4019_v23 = vadd.f32 %v3845_v13, %v1572_v54  ;;  %v4022_v52 = vpop.eup %3070  ;;  %v1813_v35 = vor.u32 1.1754944e-38, %v1812_v9  ;;  %v4046_v33 = vor.u32 1.1754944e-38, %v1842_v28  ;;  %vm4127_vm15 = vmor %vm1836_vm11, %vm1837_vm12 }
 0x29a   : > { %v3073_v54 = vpop.eup %3072  ;;  %v2822_v15 = vmul.f32 -1.442695, %v1611_v0  ;;  %3080 = vlog2.f32 %v2123_v26  ;;  %v2129_v0 = vand.u32 2147483647, %v3991_v44  ;;  %v1833_v8 = vsub.f32 1.0, %v1832_v49 }
 0x29b   : > { %v1982_v18 = vand.u32 2147483647, %v4019_v23  ;;  %v4040_v51 = vpop.eup %3074  ;;  %3082 = vrcp.f32 %v4008_v45  ;;  %v4043_v1 = vadd.f32 1.0, %v3073_v54  ;;  %v4054_v54 = vsel %vm4011_vm9, %v1813_v35, %v1809_v63 }
 0x29c   : > { %3084 = vpow2.f32 %v2822_v15  ;;  %v4049_v26 = vpop.eup %3076  ;;  %v4058_v19 = vmul.f32 %v4022_v52, %v3972_v57  ;;  %v2132_v58 = vadd.f32 1.0, %v4040_v51  ;;  %v4069_v63 = vmul.f32 %v3991_v44, %v2127_v30 }
 0x29d   : > { %v1998_v9 = vsub.f32 0.0, %v1982_v18  ;;  %3086 = vrcp.f32 %v4043_v1  ;;  %v1525_v3 = vpop.f32.mrf.mxu2  ;;  %vm4080_vm13 = vcmp.lt.f32.partialorder %v2129_v0, 0.0004427343  ;;  %v4095_v0 = vor.u32 1.1754944e-38, %v1857_v32 }
 0x29e   : > { %v1574_v5 = vpop.f32.mrf.mxu3  ;;  %v1526_v28 = vadd.f32 %v1525_v3, %v3817_v12  ;;  %vm1866_vm0 = vweird.f32 %v4043_v1  ;;  %vm1851_vm10 = vweird.f32 %v4008_v45  ;;  %vm1950_vm12 = vcmp.ne.f32.partialorder %v4019_v23, %v4019_v23 }
 0x29f   : > { %v4060_v15 = vpop.eup %3078  ;;  %v2027_v18 = vmul.f32 1.442695, %v1998_v9  ;;  %v1575_v38 = vadd.f32 %v1574_v5, %v1411_v31  ;;  %v2135_v31 = vmul.f32 -0.5, %v4040_v51  ;;  %v1834_v5 = vmul.f32 %v4003_v24, %v1833_v8  ;;  %v1413_v30 = vpop.f32.mrf.mxu1 }
 0x2a0   : > { %v2141_v49 = vadd.f32 1.0, %v4060_v15  ;;  %v3081_v35 = vpop.eup %3080  ;;  %v1613_v9 = vadd.f32 %v3840_v4, %v1526_v28 }
 0x2a1   : > { %3088 = vpow2.f32 %v2027_v18  ;;  %v4073_v12 = vadd.f32 %v3845_v13, %v1575_v38  ;;  %v4076_v3 = vpop.eup %3082  ;;  %v4097_v50 = vmul.f32 0.6931472, %v3081_v35  ;;  %v2136_v53 = vadd.f32 1.0, %v2135_v31 }
 0x2a2   : > { %v3085_v44 = vpop.eup %3084  ;;  %v2823_v18 = vmul.f32 -1.442695, %v1613_v9  ;;  %3090 = vlog2.f32 %v2132_v58  ;;  %v1835_v32 = vadd.f32 %v4003_v24, %v1834_v5  ;;  %v2144_v31 = vmul.f32 -0.5, %v4060_v15 }
 0x2a3   : > { %v1983_v28 = vand.u32 2147483647, %v4073_v12  ;;  %v4087_v43 = vpop.eup %3086  ;;  %v4089_v7 = vadd.f32 1.0, %v3085_v44  ;;  %3092 = vlog2.f32 %v2141_v49  ;;  %v1872_v38 = vand.u32 2147483648, %v4043_v1 }
 0x2a4   : > { %3094 = vpow2.f32 %v2823_v18  ;;  %v1862_v10 = vmul.f32 %v4087_v43, %v4043_v1  ;;  %v1847_v58 = vmul.f32 %v4076_v3, %v4008_v45  ;;  %v2145_v6 = vadd.f32 1.0, %v2144_v31 }
 0x2a5   : > { %v1999_v9 = vsub.f32 0.0, %v1983_v28  ;;  %3096 = vrcp.f32 %v4089_v7  ;;  %v1527_v44 = vpop.f32.mrf.mxu2  ;;  %v1887_v31 = vand.u32 2147483648, %v4089_v7  ;;  %vm1867_vm2 = vweird.f32 %v4087_v43 }
 0x2a6   : > { %v1576_v49 = vpop.f32.mrf.mxu3  ;;  %v1528_v18 = vadd.f32 %v1527_v44, %v3823_v56  ;;  %v4132_v44 = vmul.f32 %v4040_v51, %v2136_v53  ;;  %v1863_v5 = vsub.f32 1.0, %v1862_v10  ;;  %v4145_v10 = vor.u32 1.1754944e-38, %v1872_v38  ;;  %vm4197_vm7 = vmor %vm1866_vm0, %vm1867_vm2 }
 0x2a7   : > { %v4105_v39 = vpop.eup %3088  ;;  %v2029_v35 = vmul.f32 1.442695, %v1999_v9  ;;  %v1577_v28 = vadd.f32 %v1576_v49, %v1413_v30  ;;  %v1848_v47 = vsub.f32 1.0, %v1847_v58  ;;  %vm1881_vm4 = vweird.f32 %v4089_v7 }
 0x2a8   : > { %v2150_v42 = vadd.f32 1.0, %v4105_v39  ;;  %v4117_v55 = vpop.eup %3090  ;;  %v1615_v56 = vadd.f32 %v3840_v4, %v1528_v18  ;;  %v2147_v4 = vand.u32 2147483647, %v4060_v15  ;;  %v2153_v2 = vmul.f32 -0.5, %v4105_v39 }
 0x2a9   : > { %3098 = vpow2.f32 %v2029_v35  ;;  %v4121_v30 = vadd.f32 %v3845_v13, %v1577_v28  ;;  %v3093_v49 = vpop.eup %3092  ;;  %v1870_v35 = vand.u32 2147483647, %v4043_v1  ;;  %v1839_v13 = vsel %vm4127_vm15, %v4003_v24, %v1835_v32 }
 0x2aa   : > { %v3095_v18 = vpop.eup %3094  ;;  %v2824_v28 = vmul.f32 -1.442695, %v1615_v56  ;;  %3100 = vlog2.f32 %v2150_v42  ;;  %v4153_v42 = vsel %vm4091_vm14, %v4046_v33, %v1839_v13  ;;  %v1864_v38 = vmul.f32 %v4087_v43, %v1863_v5 }
 0x2ab   : > { %v1984_v46 = vand.u32 2147483647, %v4121_v30  ;;  %v4140_v60 = vpop.eup %3096  ;;  %v4142_v53 = vadd.f32 1.0, %v3095_v18  ;;  %v2143_v18 = vmul.f32 0.6931472, %v3093_v49  ;;  %v2154_v13 = vadd.f32 1.0, %v2153_v2 }
 0x2ac   : > { %3102 = vpow2.f32 %v2824_v28  ;;  %v1877_v24 = vmul.f32 %v4140_v60, %v4089_v7  ;;  %v2146_v28 = vmul.f32 %v4060_v15, %v2145_v6  ;;  %vm4160_vm1 = vcmp.lt.f32.partialorder %v2147_v4, 0.0004427343 }
 0x2ad   : > { %v2000_v9 = vsub.f32 0.0, %v1984_v46  ;;  %3104 = vrcp.f32 %v4142_v53  ;;  %v1849_v36 = vmul.f32 %v4076_v3, %v1848_v47  ;;  %vm4166_vm3 = vcmp.eq.f32.partialorder %v1870_v35, 8.507059e+37 }
 0x2ae   : > { %v1878_v33 = vsub.f32 1.0, %v1877_v24  ;;  %v1885_v6 = vand.u32 2147483647, %v4089_v7  ;;  %v1865_v15 = vadd.f32 %v4087_v43, %v1864_v38  ;;  %v4173_v49 = vor.u32 1.1754944e-38, %v1887_v31 }
 0x2af   : > { %v3099_v56 = vpop.eup %3098  ;;  %v2031_v58 = vmul.f32 1.442695, %v2000_v9  ;;  %v2156_v47 = vand.u32 2147483647, %v4105_v39  ;;  %v1900_v9 = vand.u32 2147483647, %v4142_v53  ;;  %v2149_v24 = vsel %vm4160_vm1, %v2146_v28, %v2143_v18 }
 0x2b0   : > { %v2159_v8 = vadd.f32 1.0, %v3099_v56  ;;  %v3101_v11 = vpop.eup %3100  ;;  %v2162_v32 = vmul.f32 -0.5, %v3099_v56  ;;  %v1902_v35 = vand.u32 2147483648, %v4142_v53  ;;  %vm1852_vm6 = vweird.f32 %v4076_v3 }
 0x2b1   : > { %3106 = vpow2.f32 %v2031_v58  ;;  %v1879_v58 = vmul.f32 %v4140_v60, %v1878_v33  ;;  %v2155_v4 = vmul.f32 %v4105_v39, %v2154_v13  ;;  %vm1896_vm8 = vweird.f32 %v4142_v53 }
 0x2b2   : > { %3108 = vlog2.f32 %v2159_v8  ;;  %v3103_v2 = vpop.eup %3102  ;;  %v2152_v8 = vmul.f32 0.6931472, %v3101_v11  ;;  %v2163_v37 = vadd.f32 1.0, %v2162_v32  ;;  %vm1882_vm9 = vweird.f32 %v4140_v60 }
 0x2b3   : > { %v4184_v38 = vpop.eup %3104  ;;  %v4186_v31 = vadd.f32 1.0, %v3103_v2  ;;  %v2165_v11 = vand.u32 2147483647, %v3099_v56  ;;  %v1869_v39 = vsel %vm4197_vm7, %v4087_v43, %v1865_v15  ;;  %vm4207_vm11 = vcmp.eq.f32.partialorder %v1885_v6, 8.507059e+37 }
 0x2b4   : > { %v1892_v14 = vmul.f32 %v4184_v38, %v4142_v53  ;;  %vm4213_vm14 = vcmp.lt.f32.partialorder %v2156_v47, 0.0004427343  ;;  %vm4217_vm15 = vcmp.eq.f32.partialorder %v1900_v9, 8.507059e+37  ;;  %v1903_v13 = vor.u32 1.1754944e-38, %v1902_v35 }
 0x2b5   : > { %3110 = vrcp.f32 %v4186_v31  ;;  %v4877_v43 = vmax.f32 %v3980_v17, 0.0  ;;  %vm1951_vm0 = vcmp.ne.f32.partialorder %v4073_v12, %v4073_v12  ;;  %v1880_v47 = vadd.f32 %v4140_v60, %v1879_v58 }
 0x2b6   : > { %v1893_v46 = vsub.f32 1.0, %v1892_v14  ;;  %v2158_v59 = vsel %vm4213_vm14, %v2155_v4, %v2152_v8  ;;  %vm1897_vm1 = vweird.f32 %v4184_v38  ;;  %v2164_v35 = vmul.f32 %v3099_v56, %v2163_v37  ;;  %vm4253_vm14 = vmor %vm1881_vm4, %vm1882_vm9 }
 0x2b7   : > { %v3107_v28 = vpop.eup %3106  ;;  %v2189_v6 = vadd.f32 %v2149_v24, %v4877_v43  ;;  %vm4230_vm2 = vcmp.lt.f32.partialorder %v2165_v11, 0.0004427343  ;;  %v4237_v24 = vsel %vm4166_vm3, %v4145_v10, %v1869_v39  ;;  %v4880_v58 = vand.u32 2147483647, %v4008_v45 }
 0x2b8   : > { %v3109_v15 = vpop.eup %3108  ;;  %v2168_v2 = vadd.f32 1.0, %v3107_v28  ;;  %v2171_v18 = vmul.f32 -0.5, %v3107_v28  ;;  %v1894_v14 = vmul.f32 %v4184_v38, %v1893_v46  ;;  %v2134_v8 = vmul.f32 0.6931472, %v4117_v55 }
 0x2b9   : > { %v2161_v9 = vmul.f32 0.6931472, %v3109_v15  ;;  %vm4241_vm7 = vcmp.eq.f32.partialorder %v4880_v58, 8.507059e+37  ;;  %v4885_v5 = vmax.f32 %v4019_v23, 0.0  ;;  %v1850_v39 = vadd.f32 %v4076_v3, %v1849_v36 }
 0x2ba   : > { %3112 = vlog2.f32 %v2168_v2  ;;  %v1895_v37 = vadd.f32 %v4184_v38, %v1894_v14  ;;  %vm1947_vm3 = vcmp.ne.f32.partialorder %v3918_v40, %v3918_v40  ;;  %vm1911_vm4 = vweird.f32 %v4186_v31 }
 0x2bb   : > { %v2167_v56 = vsel %vm4230_vm2, %v2164_v35, %v2161_v9  ;;  %v2190_v11 = vadd.f32 %v2158_v59, %v4885_v5  ;;  %v3111_v55 = vpop.eup %3110  ;;  %vm4266_vm2 = vmor %vm1896_vm8, %vm1897_vm1  ;;  %v2172_v7 = vadd.f32 1.0, %v2171_v18  ;;  %v1884_v59 = vsel %vm4253_vm14, %v4140_v60, %v1880_v47 }
 0x2bc   : > { %v2205_v36 = vsel %vm1949_vm5, %v3980_v17, %v2189_v6  ;;  %vm1948_vm9 = vcmp.ne.f32.partialorder %v3951_v29, %v3951_v29  ;;  %v1899_v53 = vsel %vm4266_vm2, %v4184_v38, %v1895_v37  ;;  %v1907_v1 = vmul.f32 %v3111_v55, %v4186_v31  ;;  %vm4300_vm5 = vmor %vm1851_vm10, %vm1852_vm6 }
 0x2bd   : > { %vm1952_vm8 = vcmp.ne.f32.partialorder %v4121_v30, %v4121_v30  ;;  %v4888_v46 = vmax.f32 %v4073_v12, 0.0  ;;  %v4889_v43 = vand.u32 2147483647, %v4040_v51  ;;  %v1915_v17 = vand.u32 2147483647, %v4186_v31 }
 0x2be   : > { %v1917_v6 = vand.u32 2147483648, %v4186_v31  ;;  %v2174_v2 = vand.u32 2147483647, %v3107_v28  ;;  %v1908_v18 = vsub.f32 1.0, %v1907_v1  ;;  %v1889_v47 = vsel %vm4207_vm11, %v4173_v49, %v1884_v59 }
 0x2bf   : > { %v2191_v60 = vadd.f32 %v2167_v56, %v4888_v46  ;;  %vm4290_vm1 = vcmp.lt.f32.partialorder %v4889_v43, 0.0004427343  ;;  %v2206_v14 = vsel %vm1950_vm12, %v4019_v23, %v2190_v11  ;;  %v1854_v45 = vsel %vm4300_vm5, %v4076_v3, %v1850_v39 }
 0x2c0   : > { %v2140_v51 = vsel %vm4290_vm1, %v4132_v44, %v2134_v8  ;;  %v3113_v9 = vpop.eup %3112  ;;  %v1904_v35 = vsel %vm4217_vm15, %v1903_v13, %v1899_v53  ;;  %vm1912_vm6 = vweird.f32 %v3111_v55  ;;  %v2173_v44 = vmul.f32 %v3107_v28, %v2172_v7 }
 0x2c1   : > { %v4894_v58 = vmax.f32 %v3918_v40, 0.0  ;;  %v4895_v49 = vsel %vm4080_vm13, %v4069_v63, %v4097_v50  ;;  %v1909_v8 = vmul.f32 %v3111_v55, %v1908_v18  ;;  %v2170_v23 = vmul.f32 0.6931472, %v3113_v9  ;;  %vm1913_vm13 = vmor %vm1911_vm4, %vm1912_vm6 }
 0x2c2   : > { %v2207_v3 = vsel %vm1951_vm0, %v4073_v12, %v2191_v60  ;;  %v4896_v33 = vmax.f32 %v3951_v29, 0.0  ;;  %vm4332_vm10 = vcmp.eq.f32.partialorder %v1915_v17, 8.507059e+37  ;;  %v1918_v37 = vor.u32 1.1754944e-38, %v1917_v6 }
 0x2c3   : > { %v2187_v32 = vadd.f32 %v4895_v49, %v4894_v58  ;;  %vm2175_vm11 = vcmp.lt.f32.partialorder %v2174_v2, 0.0004427343  ;;  %v2222_v16 = vmul.f32 %v2206_v14, %v1889_v47  ;;  %v1910_v56 = vadd.f32 %v3111_v55, %v1909_v8 }
 0x2c4   : > { %v2188_v13 = vadd.f32 %v2140_v51, %v4896_v33  ;;  %v2176_v50 = vsel %vm2175_vm11, %v2173_v44, %v2170_v23  ;;  %v1859_v63 = vsel %vm4241_vm7, %v4095_v0, %v1854_v45  ;;  %v4899_v10 = vsub.f32 1.0, %v4058_v19 }
 0x2c5   : > { %v4900_v5 = vmax.f32 %v4121_v30, 0.0  ;;  %v2223_v39 = vmul.f32 %v2207_v3, %v1904_v35  ;;  %v2203_v61 = vsel %vm1947_vm3, %v3918_v40, %v2187_v32  ;;  %v2105_v4 = vadd.f32 1.0, %v4015_v21 }
 0x2c6   : > { %v1819_v12 = vmul.f32 %v4022_v52, %v4899_v10  ;;  %v1914_v0 = vsel %vm1913_vm13, %v3111_v55, %v1910_v56  ;;  %v2204_v19 = vsel %vm1948_vm9, %v3951_v29, %v2188_v13  ;;  %v2108_v31 = vmul.f32 -0.5, %v4015_v21 }
 0x2c7   : > { %v2192_v11 = vadd.f32 %v2176_v50, %v4900_v5  ;;  %v2114_v7 = vadd.f32 1.0, %v4049_v26  ;;  %v1919_v59 = vsel %vm4332_vm10, %v1918_v37, %v1914_v0  ;;  %3114 = vlog2.f32 %v2105_v4 }
 0x2c8   : > { %v2117_v55 = vmul.f32 -0.5, %v4049_v26  ;;  %v1820_v1 = vadd.f32 %v4022_v52, %v1819_v12  ;;  %vm1822_vm12 = vweird.f32 %v4022_v52  ;;  %v2221_v29 = vmul.f32 %v2205_v36, %v4237_v24 }
 0x2c9   : > { %v2208_v40 = vsel %vm1952_vm8, %v4121_v30, %v2192_v11  ;;  %3116 = vlog2.f32 %v2114_v7  ;;  %v2220_v46 = vmul.f32 %v2204_v19, %v1859_v63  ;;  %v1827_v60 = vand.u32 2147483648, %v3972_v57  ;;  %v4906_v7 = vld [vmem:[#allocation46_spill] sm:$0xff] }
 0x2ca   : > { %v2224_v53 = vmul.f32 %v2208_v40, %v1919_v59  ;;  %v1772_v43 = vmul.f32 %v3987_v34, %v3947_v27  ;;  %vm1821_vm15 = vweird.f32 %v3972_v57  ;;  %v1825_v30 = vand.u32 2147483647, %v3972_v57  ;;  %v4929_v40 = vld [vmem:[#allocation44_spill] sm:$0xff] }
 0x2cb   : > { %v2109_v17 = vadd.f32 1.0, %v2108_v31  ;;  %v2252_v6 = vpack.c.bf16 %v2222_v16, %v2221_v29  ;;  %v2219_v2 = vmul.f32 %v2203_v61, %v4153_v42  ;;  %vm4374_vm0 = vmor %vm1821_vm15, %vm1822_vm12  ;;  %v2111_v24 = vand.u32 2147483647, %v4015_v21  ;;  %v4905_v31 = vld [vmem:[#allocation41_spill] sm:$0xff] }
 0x2cc   : > { %v2253_v15 = vpack.c.bf16 %v2224_v53, %v2223_v39  ;;  %v2118_v36 = vadd.f32 1.0, %v2117_v55  ;;  %v1824_v51 = vsel %vm4374_vm0, %v4022_v52, %v1820_v1  ;;  %v2120_v18 = vand.u32 2147483647, %v4049_v26 }
 0x2cd   : > { %v1773_v47 = vsub.f32 1.0, %v1772_v43  ;;  %v1787_v57 = vmul.f32 %v4006_v41, %v3965_v48  ;;  %v3115_v14 = vpop.eup %3114  ;;  %v2251_v42 = vpack.c.bf16 %v2220_v46, %v2219_v2  ;;  %v1828_v45 = vor.u32 1.1754944e-38, %v1827_v60  ;;  %v4912_v60 = vld [vmem:[#allocation48_spill] sm:$0xff] }
 0x2ce   : > { %2254 = vmatpush.bf16.msrb.mxu0 %v2253_v15  ;;  %vm1945_vm7 = vcmp.ne.f32.partialorder %v3924_v20, %v3924_v20  ;;  %vm1946_vm14 = vcmp.ne.f32.partialorder %v3944_v25, %v3944_v25  ;;  %vm1826_vm3 = vcmp.eq.f32.partialorder %v1825_v30, 8.507059e+37  ;;  %v2107_v35 = vmul.f32 0.6931472, %v3115_v14  ;;  %v4932_v30 = vld [vmem:[#allocation28_spill] sm:$0xff] }
 0x2cf   : > { %v3117_v9 = vpop.eup %3116  ;;  %v2110_v52 = vmul.f32 %v4015_v21, %v2109_v17  ;;  %v1788_v44 = vsub.f32 1.0, %v1787_v57  ;;  %v1829_v58 = vsel %vm1826_vm3, %v1828_v45, %v1824_v51  ;;  %vm2112_vm2 = vcmp.lt.f32.partialorder %v2111_v24, 0.0004427343  ;;  %v4917_v45 = vld [vmem:[#allocation36_spill] sm:$0xff] }
 0x2d0   : > { %v2116_v49 = vmul.f32 0.6931472, %v3117_v9  ;;  %v2119_v32 = vmul.f32 %v4049_v26, %v2118_v36  ;;  %vm2121_vm4 = vcmp.lt.f32.partialorder %v2120_v18, 0.0004427343  ;;  %v1774_v23 = vmul.f32 %v3987_v34, %v1773_v47  ;;  %v4918_v9 = vld [vmem:[#allocation45_spill] sm:$0xff] }
 0x2d1   : > { %v2113_v8 = vsel %vm2112_vm2, %v2110_v52, %v2107_v35  ;;  %v2087_v3 = vadd.f32 1.0, %v3982_v22  ;;  %v4903_v13 = vmax.f32 %v3924_v20, 0.0  ;;  %vm1776_vm9 = vweird.f32 %v3947_v27 }
 0x2d2   : > { %2255 = vmatpush.bf16.msrb.mxu0 %v2252_v6  ;;  %v2122_v33 = vsel %vm2121_vm4, %v2119_v32, %v2116_v49  ;;  %v2090_v21 = vmul.f32 -0.5, %v3982_v22  ;;  %v4904_v37 = vmax.f32 %v3944_v25, 0.0  ;;  %vm1777_vm8 = vweird.f32 %v3987_v34 }
 0x2d3   : > { %v2185_v28 = vadd.f32 %v2113_v8, %v4903_v13  ;;  %v1789_v26 = vmul.f32 %v4006_v41, %v1788_v44  ;;  %3118 = vlog2.f32 %v2087_v3  ;;  %v1780_v50 = vand.u32 2147483647, %v3947_v27  ;;  %vm4425_vm5 = vmor %vm1776_vm9, %vm1777_vm8  ;;  %v4920_v13 = vld [vmem:[#allocation47_spill] sm:$0xff] }
 0x2d4   : > { %v2186_v16 = vadd.f32 %v2122_v33, %v4904_v37  ;;  %v1782_v63 = vand.u32 2147483648, %v3947_v27  ;;  %v2096_v10 = vadd.f32 1.0, %v3998_v62  ;;  %v1775_v11 = vadd.f32 %v3987_v34, %v1774_v23  ;;  %v4911_v27 = vld [vmem:[#allocation42_spill] sm:$0xff] }
 0x2d5   : > { %v2201_v56 = vsel %vm1945_vm7, %v3924_v20, %v2185_v28  ;;  %v2099_v39 = vmul.f32 -0.5, %v3998_v62  ;;  %vm1792_vm1 = vweird.f32 %v4006_v41  ;;  %v2091_v20 = vadd.f32 1.0, %v2090_v21  ;;  %v4921_v21 = vld [vmem:[#allocation30_spill] sm:$0xff] }
 0x2d6   : > { %2256 = vmatpush.bf16.msrb.mxu0 %v2251_v42  ;;  %v2202_v12 = vsel %vm1946_vm14, %v3944_v25, %v2186_v16  ;;  %v2217_v5 = vmul.f32 %v2201_v56, %v4054_v54  ;;  %3120 = vlog2.f32 %v2096_v10  ;;  %v1790_v4 = vadd.f32 %v4006_v41, %v1789_v26  ;;  %v4928_v54 = vld [vmem:[#allocation38_spill] sm:$0xff] }
 0x2d7   : > { %v2218_v61 = vmul.f32 %v2202_v12, %v1829_v58  ;;  %v1795_v0 = vand.u32 2147483647, %v3965_v48  ;;  %v2093_v19 = vand.u32 2147483647, %v3982_v22  ;;  %v1742_v25 = vmul.f32 %v4906_v7, %v4905_v31 }
 0x2d8   : > { %vm4429_vm6 = vcmp.eq.f32.partialorder %v1780_v50, 8.507059e+37  ;;  %v1797_v55 = vand.u32 2147483648, %v3965_v48  ;;  %v2100_v53 = vadd.f32 1.0, %v2099_v39  ;;  %v1779_v29 = vsel %vm4425_vm5, %v3987_v34, %v1775_v11  ;;  %v4915_v34 = vld [vmem:[#allocation33_spill] sm:$0xff]  ;;  %v4926_v39 = vld [vmem:[#allocation31_spill] sm:$0xff] }
 0x2d9   : > { %v2250_v59 = vpack.c.bf16 %v2218_v61, %v2217_v5  ;;  %v3119_v1 = vpop.eup %3118  ;;  %vm1791_vm10 = vweird.f32 %v3965_v48  ;;  %v1743_v46 = vsub.f32 1.0, %v1742_v25  ;;  %v1757_v43 = vmul.f32 %v4912_v60, %v4911_v27  ;;  %v4927_v61 = vld [vmem:[#allocation40_spill] sm:$0xff] }
 0x2da   : > { %v1783_v15 = vor.u32 1.1754944e-38, %v1782_v63  ;;  %vm4442_vm11 = vmor %vm1791_vm10, %vm1792_vm1  ;;  %v2089_v17 = vmul.f32 0.6931472, %v3119_v1  ;;  %v2092_v6 = vmul.f32 %v3982_v22, %v2091_v20  ;;  %v2102_v2 = vand.u32 2147483647, %v3998_v62 }
 0x2db   : > { %2257 = vmatpush.bf16.msrb.mxu0 %v2250_v59  ;;  %v1794_v48 = vsel %vm4442_vm11, %v4006_v41, %v1790_v4  ;;  %vm1796_vm13 = vcmp.eq.f32.partialorder %v1795_v0, 8.507059e+37  ;;  %vm1943_vm12 = vcmp.ne.f32.partialorder %v4915_v34, %v4915_v34  ;;  %vm2094_vm15 = vcmp.lt.f32.partialorder %v2093_v19, 0.0004427343 }
 0x2dc   : > { %v3121_v38 = vpop.eup %3120  ;;  %v1784_v24 = vsel %vm4429_vm6, %v1783_v15, %v1779_v29  ;;  %v1798_v36 = vor.u32 1.1754944e-38, %v1797_v55  ;;  %v2095_v51 = vsel %vm2094_vm15, %v2092_v6, %v2089_v17  ;;  %v2101_v18 = vmul.f32 %v3998_v62, %v2100_v53 }
 0x2dd   : > { %v2098_v22 = vmul.f32 0.6931472, %v3121_v38  ;;  %v4916_v47 = vmax.f32 %v4915_v34, 0.0  ;;  %v1744_v14 = vmul.f32 %v4906_v7, %v1743_v46  ;;  %v1758_v41 = vsub.f32 1.0, %v1757_v43 }
 0x2de   : > { %v1799_v42 = vsel %vm1796_vm13, %v1798_v36, %v1794_v48  ;;  %vm1944_vm0 = vcmp.ne.f32.partialorder %v4917_v45, %v4917_v45  ;;  %vm2103_vm7 = vcmp.lt.f32.partialorder %v2102_v2, 0.0004427343  ;;  %v2069_v35 = vadd.f32 1.0, %v4918_v9  ;;  %v4933_v48 = vld [vmem:[#allocation39_spill] sm:$0xff] }
 0x2df   : > { %v2183_v57 = vadd.f32 %v2095_v51, %v4916_v47  ;;  %v2104_v52 = vsel %vm2103_vm7, %v2101_v18, %v2098_v22  ;;  %v1750_v44 = vand.u32 2147483647, %v4905_v31  ;;  %v2072_v58 = vmul.f32 -0.5, %v4918_v9 }
 0x2e0   : > { %v4919_v49 = vmax.f32 %v4917_v45, 0.0  ;;  %v1752_v23 = vand.u32 2147483648, %v4905_v31  ;;  %3122 = vlog2.f32 %v2069_v35  ;;  %v1745_v3 = vadd.f32 %v4906_v7, %v1744_v14  ;;  %v4935_v35 = vld [vmem:[#allocation43_spill] sm:$0xff] }
 0x2e1   : > { %v2199_v62 = vsel %vm1943_vm12, %v4915_v34, %v2183_v57  ;;  %vm1747_vm14 = vweird.f32 %v4906_v7  ;;  %v1759_v33 = vmul.f32 %v4912_v60, %v1758_v41  ;;  %v2078_v28 = vadd.f32 1.0, %v4920_v13 }
 0x2e2   : > { %v2184_v32 = vadd.f32 %v2104_v52, %v4919_v49  ;;  %v2215_v8 = vmul.f32 %v2199_v62, %v1784_v24  ;;  %v1926_v37 = vmax.f32 %v4921_v21, 0.0  ;;  %vm1746_vm3 = vweird.f32 %v4905_v31 }
 0x2e3   : > { %v2081_v26 = vmul.f32 -0.5, %v4920_v13  ;;  %vm4482_vm2 = vcmp.eq.f32.partialorder %v1750_v44, 8.507059e+37  ;;  %v2073_v63 = vadd.f32 1.0, %v2072_v58  ;;  %3124 = vlog2.f32 %v2078_v28  ;;  %vm4486_vm4 = vmor %vm1746_vm3, %vm1747_vm14  ;;  %v4938_v28 = vld [vmem:[#allocation27_spill] sm:$0xff] }
 0x2e4   : > { %v2200_v16 = vsel %vm1944_vm0, %v4917_v45, %v2184_v32  ;;  %v1753_v12 = vor.u32 1.1754944e-38, %v1752_v23  ;;  %v1767_v5 = vand.u32 2147483648, %v4911_v27  ;;  %v2075_v11 = vand.u32 2147483647, %v4918_v9 }
 0x2e5   : > { %v2216_v56 = vmul.f32 %v2200_v16, %v1799_v42  ;;  %v1712_v20 = vmul.f32 %v4927_v61, %v4926_v39  ;;  %v1749_v0 = vsel %vm4486_vm4, %v4906_v7, %v1745_v3  ;;  %v1760_v19 = vadd.f32 %v4912_v60, %v1759_v33 }
 0x2e6   : > { %vm1762_vm9 = vweird.f32 %v4912_v60  ;;  %v3123_v31 = vpop.eup %3122  ;;  %vm1761_vm8 = vweird.f32 %v4911_v27  ;;  %v2082_v25 = vadd.f32 1.0, %v2081_v26  ;;  %v1727_v55 = vmul.f32 %v4929_v40, %v4928_v54 }
 0x2e7   : > { %v2249_v4 = vpack.c.bf16 %v2216_v56, %v2215_v8  ;;  %v1713_v59 = vsub.f32 1.0, %v1712_v20  ;;  %v1765_v53 = vand.u32 2147483647, %v4911_v27  ;;  %v2071_v1 = vmul.f32 0.6931472, %v3123_v31  ;;  %vm4507_vm1 = vmor %vm1761_vm8, %vm1762_vm9  ;;  %v4944_v31 = vld [vmem:[#allocation25_spill] sm:$0xff] }
 0x2e8   : > { %v2074_v29 = vmul.f32 %v4918_v9, %v2073_v63  ;;  %v2084_v7 = vand.u32 2147483647, %v4920_v13  ;;  %v1754_v46 = vsel %vm4482_vm2, %v1753_v12, %v1749_v0  ;;  %v1768_v15 = vor.u32 1.1754944e-38, %v1767_v5 }
 0x2e9   : > { %2258 = vmatpush.bf16.msrb.mxu0 %v2249_v4  ;;  %vm1941_vm5 = vcmp.ne.f32.partialorder %v4932_v30, %v4932_v30  ;;  %vm2076_vm6 = vcmp.lt.f32.partialorder %v2075_v11, 0.0004427343  ;;  %v3125_v17 = vpop.eup %3124  ;;  %v1764_v27 = vsel %vm4507_vm1, %v4912_v60, %v1760_v19  ;;  %v1714_v2 = vmul.f32 %v4927_v61, %v1713_v59 }
 0x2ea   : > { %v2077_v6 = vsel %vm2076_vm6, %v2074_v29, %v2071_v1  ;;  %v2051_v34 = vadd.f32 1.0, %v4933_v48  ;;  %v2080_v38 = vmul.f32 0.6931472, %v3125_v17  ;;  %v2083_v24 = vmul.f32 %v4920_v13, %v2082_v25 }
 0x2eb   : > { %v4934_v36 = vmax.f32 %v4932_v30, 0.0  ;;  %v1728_v18 = vsub.f32 1.0, %v1727_v55  ;;  %vm1766_vm10 = vcmp.eq.f32.partialorder %v1765_v53, 8.507059e+37  ;;  %vm2085_vm11 = vcmp.lt.f32.partialorder %v2084_v7, 0.0004427343  ;;  %v4946_v53 = vld [vmem:[#allocation26_spill] sm:$0xff] }
 0x2ec   : > { %3126 = vlog2.f32 %v2051_v34  ;;  %v2054_v22 = vmul.f32 -0.5, %v4933_v48  ;;  %v1769_v47 = vsel %vm1766_vm10, %v1768_v15, %v1764_v27  ;;  %vm1942_vm13 = vcmp.ne.f32.partialorder %v4921_v21, %v4921_v21  ;;  %v4947_v27 = vld [vmem:[#allocation32_spill] sm:$0xff] }
 0x2ed   : > { %v2181_v51 = vadd.f32 %v2077_v6, %v4934_v36  ;;  %v2086_v60 = vsel %vm2085_vm11, %v2083_v24, %v2080_v38  ;;  %v1715_v42 = vadd.f32 %v4927_v61, %v1714_v2  ;;  %vm1717_vm12 = vweird.f32 %v4927_v61  ;;  %v4948_v24 = vld [vmem:[#allocation35_spill] sm:$0xff] }
 0x2ee   : > { %v2182_v14 = vadd.f32 %v2086_v60, %v1926_v37  ;;  %vm1716_vm15 = vweird.f32 %v4926_v39  ;;  %v1729_v45 = vmul.f32 %v4929_v40, %v1728_v18  ;;  %v2055_v9 = vadd.f32 1.0, %v2054_v22 }
 0x2ef   : > { %v2197_v57 = vsel %vm1941_vm5, %v4932_v30, %v2181_v51  ;;  %v2060_v52 = vadd.f32 1.0, %v4935_v35  ;;  %v1722_v44 = vand.u32 2147483648, %v4926_v39  ;;  %v2057_v58 = vand.u32 2147483647, %v4933_v48  ;;  %vm4537_vm0 = vmor %vm1716_vm15, %vm1717_vm12 }
 0x2f0   : > { %v2213_v41 = vmul.f32 %v2197_v57, %v1754_v46  ;;  %v2198_v62 = vsel %vm1942_vm13, %v4921_v21, %v2182_v14  ;;  %v2063_v49 = vmul.f32 -0.5, %v4935_v35  ;;  %v1720_v23 = vand.u32 2147483647, %v4926_v39  ;;  %v4939_v21 = vld [vmem:[#allocation34_spill] sm:$0xff]  ;;  %v4940_v39 = vld [vmem:[#allocation29_spill] sm:$0xff] }
 0x2f1   : > { %v2214_v32 = vmul.f32 %v2198_v62, %v1769_v47  ;;  %vm1731_vm7 = vweird.f32 %v4928_v54  ;;  %3128 = vlog2.f32 %v2060_v52  ;;  %v1719_v33 = vsel %vm4537_vm0, %v4927_v61, %v1715_v42  ;;  %v4941_v61 = vld [vmem:[#allocation37_spill] sm:$0xff]  ;;  %v4949_v42 = vld [vmem:[#allocation23_spill] sm:$0xff] }
 0x2f2   : > { %v3127_v3 = vpop.eup %3126  ;;  %vm1732_vm14 = vweird.f32 %v4929_v40  ;;  %v1737_v13 = vand.u32 2147483648, %v4928_v54  ;;  %v1682_v37 = vmul.f32 %v4939_v21, %v4938_v28  ;;  %v1730_v26 = vadd.f32 %v4929_v40, %v1729_v45 }
 0x2f3   : > { %v2248_v16 = vpack.c.bf16 %v2214_v32, %v2213_v41  ;;  %v2053_v56 = vmul.f32 0.6931472, %v3127_v3  ;;  %v2056_v50 = vmul.f32 %v4933_v48, %v2055_v9  ;;  %v1723_v63 = vor.u32 1.1754944e-38, %v1722_v44  ;;  %vm4559_vm4 = vmor %vm1731_vm7, %vm1732_vm14 }
 0x2f4   : > { %vm2058_vm3 = vcmp.lt.f32.partialorder %v2057_v58, 0.0004427343  ;;  %v2064_v10 = vadd.f32 1.0, %v2063_v49  ;;  %v2066_v12 = vand.u32 2147483647, %v4935_v35  ;;  %vm1721_vm2 = vcmp.eq.f32.partialorder %v1720_v23, 8.507059e+37 }
 0x2f5   : > { %2259 = vmatpush.bf16.msrb.mxu0 %v2248_v16  ;;  %v2059_v5 = vsel %vm2058_vm3, %v2056_v50, %v2053_v56  ;;  %v1683_v11 = vsub.f32 1.0, %v1682_v37  ;;  %v1697_v20 = vmul.f32 %v4941_v61, %v4940_v39  ;;  %v1724_v4 = vsel %vm1721_vm2, %v1723_v63, %v1719_v33 }
 0x2f6   : > { %v1735_v19 = vand.u32 2147483647, %v4928_v54  ;;  %v4945_v25 = vmax.f32 %v4944_v31, 0.0  ;;  %v1924_v1 = vmax.f32 %v4946_v53, 0.0  ;;  %v1734_v29 = vsel %vm4559_vm4, %v4929_v40, %v1730_v26 }
 0x2f7   : > { %v3129_v55 = vpop.eup %3128  ;;  %v1738_v7 = vor.u32 1.1754944e-38, %v1737_v13  ;;  %vm1939_vm9 = vcmp.ne.f32.partialorder %v4944_v31, %v4944_v31  ;;  %v2065_v43 = vmul.f32 %v4935_v35, %v2064_v10  ;;  %vm2067_vm8 = vcmp.lt.f32.partialorder %v2066_v12, 0.0004427343  ;;  %v4953_v10 = vld [vmem:[#allocation24_spill] sm:$0xff] }
 0x2f8   : > { %v2179_v59 = vadd.f32 %v2059_v5, %v4945_v25  ;;  %v2062_v46 = vmul.f32 0.6931472, %v3129_v55  ;;  %v1684_v30 = vmul.f32 %v4939_v21, %v1683_v11  ;;  %v1698_v17 = vsub.f32 1.0, %v1697_v20 }
 0x2f9   : > { %v2033_v6 = vadd.f32 1.0, %v4947_v27  ;;  %vm1736_vm1 = vcmp.eq.f32.partialorder %v1735_v19, 8.507059e+37  ;;  %v2036_v40 = vmul.f32 -0.5, %v4947_v27  ;;  %vm1940_vm5 = vcmp.ne.f32.partialorder %v4946_v53, %v4946_v53 }
 0x2fa   : > { %v2195_v54 = vsel %vm1939_vm9, %v4944_v31, %v2179_v59  ;;  %v2068_v2 = vsel %vm2067_vm8, %v2065_v43, %v2062_v46  ;;  %v1739_v48 = vsel %vm1736_vm1, %v1738_v7, %v1734_v29  ;;  %vm1687_vm6 = vweird.f32 %v4939_v21  ;;  %v2242_v29 = vld [vmem:[#allocation3] sm:$0xff]  ;;  %v2243_v43 = vld [vmem:[#allocation3 + $0x18] sm:$0xff] }
 0x2fb   : > { %v2211_v15 = vmul.f32 %v2195_v54, %v1724_v4  ;;  %v2180_v34 = vadd.f32 %v2068_v2, %v1924_v1  ;;  %3130 = vlog2.f32 %v2033_v6  ;;  %v1692_v38 = vand.u32 2147483648, %v4938_v28  ;;  %v2245_v6 = vld [vmem:[#allocation3 + $0x10] sm:$0xff] }
 0x2fc   : > { %v2042_v36 = vadd.f32 1.0, %v4948_v24  ;;  %v1685_v18 = vadd.f32 %v4939_v21, %v1684_v30  ;;  %v1699_v22 = vmul.f32 %v4941_v61, %v1698_v17  ;;  %v2045_v47 = vmul.f32 -0.5, %v4948_v24  ;;  %v2244_v30 = vld [vmem:[#allocation3 + $0x8] sm:$0xff] }
 0x2fd   : > { %v2196_v51 = vsel %vm1940_vm5, %v4946_v53, %v2180_v34  ;;  %v2037_v57 = vadd.f32 1.0, %v2036_v40  ;;  %vm1686_vm10 = vweird.f32 %v4938_v28  ;;  %v1690_v14 = vand.u32 2147483647, %v4938_v28 }
 0x2fe   : > { %v2212_v60 = vmul.f32 %v2196_v51, %v1739_v48  ;;  %3132 = vlog2.f32 %v2042_v36  ;;  %v2039_v41 = vand.u32 2147483647, %v4947_v27  ;;  %v1921_v45 = vmax.f32 %v4949_v42, 0.0  ;;  %vm4592_vm11 = vmor %vm1686_vm10, %vm1687_vm6 }
 0x2ff   : > { %vm1702_vm13 = vweird.f32 %v4941_v61  ;;  %v1689_v62 = vsel %vm4592_vm11, %v4939_v21, %v1685_v18  ;;  %v1693_v44 = vor.u32 1.1754944e-38, %v1692_v38  ;;  %v1700_v58 = vadd.f32 %v4941_v61, %v1699_v22 }
 0x300   : > { %v2247_v9 = vpack.c.bf16 %v2212_v60, %v2211_v15  ;;  %v2046_v49 = vadd.f32 1.0, %v2045_v47  ;;  %v1707_v32 = vand.u32 2147483648, %v4940_v39  ;;  %v2038_v23 = vmul.f32 %v4947_v27, %v2037_v57 }
 0x301   : > { %v3131_v52 = vpop.eup %3130  ;;  %v2048_v3 = vand.u32 2147483647, %v4948_v24  ;;  %vm1691_vm12 = vcmp.eq.f32.partialorder %v1690_v14, 8.507059e+37  ;;  %vm1701_vm15 = vweird.f32 %v4940_v39  ;;  %v1705_v33 = vand.u32 2147483647, %v4940_v39 }
 0x302   : > { %2260 = vmatpush.bf16.msrb.mxu0 %v2247_v9  ;;  %v2035_v8 = vmul.f32 0.6931472, %v3131_v52  ;;  %vm2040_vm0 = vcmp.lt.f32.partialorder %v2039_v41, 0.0004427343  ;;  %v1694_v28 = vsel %vm1691_vm12, %v1693_v44, %v1689_v62  ;;  %vm1703_vm7 = vmor %vm1701_vm15, %vm1702_vm13  ;;  %v4952_v37 = vlaneseq }
 0x303   : > { %v1704_v26 = vsel %vm1703_vm7, %v4941_v61, %v1700_v58  ;;  %v2047_v50 = vmul.f32 %v4948_v24, %v2046_v49  ;;  %v1922_v12 = vmax.f32 %v4953_v10, 0.0  ;;  %v1708_v5 = vor.u32 1.1754944e-38, %v1707_v32  ;;  %v3005_v61 = vld [vmem:[%s3577_s9] ss:$0 sm:$0xff] }
 0x304   : > { %v3133_v13 = vpop.eup %3132  ;;  %v2041_v21 = vsel %vm2040_vm0, %v2038_v23, %v2035_v8  ;;  %v2226_v16 = vshrl.u32 %v4952_v37, 7  ;;  %vm1937_vm14 = vcmp.ne.f32.partialorder %v4949_v42, %v4949_v42  ;;  %vm2049_vm3 = vcmp.lt.f32.partialorder %v2048_v3, 0.0004427343 }
 0x305   : > { %v2044_v56 = vmul.f32 0.6931472, %v3133_v13  ;;  %v2177_v63 = vadd.f32 %v2041_v21, %v1921_v45  ;;  %vm1706_vm2 = vcmp.eq.f32.partialorder %v1705_v33, 8.507059e+37  ;;  %vm1938_vm4 = vcmp.ne.f32.partialorder %v4953_v10, %v4953_v10 }
 0x306   : > { %v1709_v20 = vsel %vm1706_vm2, %v1708_v5, %v1704_v26  ;;  %v2227_v19 = vadd.s32 8, %v2226_v16  ;;  %vm2232_vm9 = vcmp.eq.s32.totalorder %v2226_v16, %v3005_v61  ;;  %v3333_v55 = vmov 1.0|1.0  }
 0x307   : > { %v2050_v11 = vsel %vm2049_vm3, %v2047_v50, %v2044_v56  ;;  %v2193_v39 = vsel %vm1937_vm14, %v4949_v42, %v2177_v63  ;;  %v2228_v53 = vadd.s32 16, %v2226_v16  ;;  %v2229_v1 = vadd.s32 24, %v2226_v16 }
 0x308   : > { %v2178_v4 = vadd.f32 %v2050_v11, %v1922_v12  ;;  %v2209_v0 = vmul.f32 %v2193_v39, %v1694_v28  ;;  %vm2233_vm8 = vcmp.eq.s32.totalorder %v2227_v19, %v3005_v61 }
 0x309   : > { %vm2825_vm1 = vmpackc.low %vm2233_vm8, %vm2232_vm9  ;;  %vm2234_vm5 = vcmp.eq.s32.totalorder %v2228_v53, %v3005_v61  ;;  %vm2235_vm6 = vcmp.eq.s32.totalorder %v2229_v1, %v3005_v61 }
 0x30a   : > { %v2194_v31 = vsel %vm1938_vm4, %v4953_v10, %v2178_v4  ;;  %vm2827_vm10 = vmpackc.low %vm2235_vm6, %vm2234_vm5 }
 0x30b   : > { %v2210_v25 = vmul.f32 %v2194_v31, %v1709_v20 }
 0x30d   : > { %v2246_v59 = vpack.c.bf16 %v2210_v25, %v2209_v0 }
 0x30f   : > { %2261 = vmatpush.bf16.msrb.mxu0 %v2246_v59 }
 0x312   : > { %2826 = vmatmul.msk.bf16.vlgmr.msrb.gmra.mxu0 %vm2825_vm1, %v3333_v55 }
 0x322   : > { %2828 = vmatmul.msk.bf16.gmra.mxu0 %vm2827_vm10, %v3333_v55 }
 0x38f   : > { %v2263_v7 = vpop.f32.mrf.mxu0 }
 0x390   : > { %v2273_v46 = vadd.f32 %v2263_v7, %v2242_v29 }
 0x392   : > { %2277 = vst [vmem:[#allocation3] sm:$0xff] %v2273_v46 }
 0x397   : > { %v2265_v54 = vpop.f32.mrf.mxu0 }
 0x398   : > { %v2274_v15 = vadd.f32 %v2265_v54, %v2243_v43 }
 0x39a   : > { %2278 = vst [vmem:[#allocation3 + $0x18] sm:$0xff] %v2274_v15 }
 0x39f   : > { %v2268_v17 = vpop.f32.mrf.mxu0 }
 0x3a0   : > { %v2275_v27 = vadd.f32 %v2268_v17, %v2244_v30 }
 0x3a2   : > { %2279 = vst [vmem:[#allocation3 + $0x8] sm:$0xff] %v2275_v27 }
 0x3a6   : > { %2284 = sbr.rel (%p2829_p13) target bundleno = 953 (0x3b9), region = 100 }
 0x3a7   : > { %v2270_v2 = vpop.f32.mrf.mxu0 }
 0x3a8   : > { %v2276_v40 = vadd.f32 %v2270_v2, %v2245_v6 }
 0x3aa   : > { %2280 = vst [vmem:[#allocation3 + $0x10] sm:$0xff] %v2276_v40 }
 0x3ab   : > { %v2285_v48 = vld [vmem:[#allocation2 + $0x10] sm:$0xff]  ;;  %v2289_v34 = vld [vmem:[#allocation3] sm:$0xff]  ;;  %v2290_v51 = vld [vmem:[#allocation3 + $0x18] sm:$0xff] }
 0x3ac   : > { %v3134_v38 = vld [vmem:[%s683_s8] ss:$0 sm:$0xff]  ;;  %v2287_v18 = vld [vmem:[#allocation2 + $0x18] sm:$0xff]  ;;  %v2291_v60 = vld [vmem:[#allocation3 + $0x8] sm:$0xff] }
 0x3ad   : > { %v3135_v24 = vld [vmem:[%s686_s7] ss:$0 sm:$0xff]  ;;  %v2297_v22 = vmul.f32 %v3134_v38, %v2289_v34  ;;  %v2298_v47 = vmul.f32 %v3134_v38, %v2290_v51  ;;  %v2288_v57 = vld [vmem:[#allocation2 + $0x8] sm:$0xff]  ;;  %v2299_v41 = vmul.f32 %v3134_v38, %v2291_v60 }
 0x3ae   : > { %v2286_v36 = vld [vmem:[#allocation2] sm:$0xff] }
 0x3af   : > { %v2301_v45 = vadd.f32 %v2297_v22, %v2285_v48  ;;  %v2302_v9 = vadd.f32 %v2298_v47, %v2286_v36  ;;  %v2303_v35 = vadd.f32 %v2299_v41, %v2287_v18 }
 0x3b1   : > { %v2292_v14 = vld [vmem:[#allocation3 + $0x10] sm:$0xff]  ;;  %v2309_v62 = vadd.f32 %v3135_v24, %v2301_v45  ;;  %v2310_v44 = vadd.f32 %v3135_v24, %v2302_v9  ;;  %v2311_v58 = vadd.f32 %v3135_v24, %v2303_v35 }
 0x3b2   : > { %v2300_v42 = vmul.f32 %v3134_v38, %v2292_v14 }
 0x3b3   : > { %2313 = vst [vmem:[#allocation2 + $0x10] sm:$0xff] %v2309_v62 }
 0x3b4   : > { %v2304_v52 = vadd.f32 %v2300_v42, %v2288_v57  ;;  %2314 = vst [vmem:[#allocation2] sm:$0xff] %v2310_v44 }
 0x3b5   : > { %2315 = vst [vmem:[#allocation2 + $0x18] sm:$0xff] %v2311_v58 }
 0x3b6   : > { %v2312_v49 = vadd.f32 %v3135_v24, %v2304_v52 }
 0x3b8   : > { %2316 = vst [vmem:[#allocation2 + $0x8] sm:$0xff] %v2312_v49 }
 0x3b9 PF: > { %p2317_p1 = scmp.eq.s32.totalorder %s3313_s22, 2 }
 0x3bb   : > { %p2318_p3 = pnand %p2317_p1, %p2281_p12 }
 0x3bc   : > { %s4956_s9 = sld [smem:[#allocation61_spill]] (!%p2318_p3) }
 0x3bd   : > { %2321 = sbr.rel (%p2318_p3) target bundleno = 1225 (0x4c9), region = 104  ;;  %s4957_s5 = sld [smem:[#allocation60_spill]] (!%p2318_p3) }
 0x3be   : > { %s4958_s28 = sld [smem:[#allocation62_spill]] (!%p2318_p3) }
 0x3c2   : > { %v2326_v32 = vld [vmem:[#allocation2 + $0x8] sm:$0xff]  ;;  %v2325_v8 = vld [vmem:[#allocation2 + $0x18] sm:$0xff]  ;;  %v2324_v3 = vld [vmem:[#allocation2] sm:$0xff]  ;;  %vm2327_vm11 = vcmask 261120   ;;  %vm2391_vm13 = vcmask 1024  }
 0x3c3   : > { %2343 = vmatpush.msra.mxu0 %v2326_v32  ;;  %v2366_v23 = vld [vmem:[%s4956_s9 + $0x78] sm:$0xff]  ;;  %v2365_v33 = vld [vmem:[%s4956_s9 + $0x70] sm:$0xff]  ;;  %v2364_v13 = vld [vmem:[%s4956_s9 + $0x68] sm:$0xff] }
 0x3c4   : > { %2371 = vmatpush.msra.mxu1 %v2366_v23  ;;  %v2323_v28 = vld [vmem:[#allocation2 + $0x10] sm:$0xff]  ;;  %v2322_v21 = vld [vmem:[%s4957_s5] sm:$0x3]  ;;  %v2362_v16 = vld [vmem:[%s4956_s9 + $0x58] sm:$0xff] }
 0x3c5   : > { %2344 = vmatpush.msra.mxu0 %v2325_v8  ;;  %v2363_v37 = vld [vmem:[%s4956_s9 + $0x60] sm:$0xff]  ;;  %v2361_v26 = vld [vmem:[%s4956_s9 + $0x50] sm:$0xff]  ;;  %v2360_v56 = vld [vmem:[%s4956_s9 + $0x48] sm:$0xff] }
 0x3c6   : > { %2372 = vmatpush.msra.mxu1 %v2365_v33  ;;  %v2359_v50 = vld [vmem:[%s4956_s9 + $0x40] sm:$0xff]  ;;  %v2358_v63 = vld [vmem:[%s4956_s9 + $0x38] sm:$0xff]  ;;  %v2357_v10 = vld [vmem:[%s4956_s9 + $0x30] sm:$0xff] }
 0x3c7   : > { %2345 = vmatpush.msra.mxu0 %v2324_v3  ;;  %v2356_v12 = vld [vmem:[%s4956_s9 + $0x28] sm:$0xff]  ;;  %v2355_v5 = vld [vmem:[%s4956_s9 + $0x20] sm:$0xff]  ;;  %v2354_v11 = vld [vmem:[%s4956_s9 + $0x18] sm:$0xff] }
 0x3c8   : > { %2373 = vmatpush.msra.mxu1 %v2364_v13  ;;  %v2353_v39 = vld [vmem:[%s4956_s9 + $0x10] sm:$0xff]  ;;  %v2352_v20 = vld [vmem:[%s4956_s9 + $0x8] sm:$0xff]  ;;  %v2351_v4 = vld [vmem:[%s4956_s9] sm:$0xff] }
 0x3c9   : > { %2346 = vmatpush.msra.mxu0 %v2323_v28  ;;  %v3136_v19 = vld [vmem:[#allocation5] ss:$0 sm:$0xff] }
 0x3ca   : > { %2830 = vmatmul.msk.f32.vlgmr.msra.gmra.mxu0 %vm2327_vm11, %v2322_v21  ;;  %2374 = vmatpush.msra.mxu1 %v2363_v37 }
 0x3cc   : > { %2375 = vmatpush.msra.mxu1 %v2362_v16 }
 0x3ce   : > { %2376 = vmatpush.msra.mxu1 %v2361_v26 }
 0x3d0   : > { %2377 = vmatpush.msra.mxu1 %v2360_v56 }
 0x3d2   : > { %2378 = vmatpush.msra.mxu1 %v2359_v50 }
 0x3d4   : > { %2379 = vmatpush.msra.mxu1 %v2358_v63 }
 0x3d6   : > { %2380 = vmatpush.msra.mxu1 %v2357_v10 }
 0x3d8   : > { %2381 = vmatpush.msra.mxu1 %v2356_v12 }
 0x3da   : > { %2382 = vmatpush.msra.mxu1 %v2355_v5 }
 0x3dc   : > { %2383 = vmatpush.msra.mxu1 %v2354_v11 }
 0x3de   : > { %2384 = vmatpush.msra.mxu1 %v2353_v39 }
 0x3e0   : > { %2385 = vmatpush.msra.mxu1 %v2352_v20 }
 0x3e2   : > { %2386 = vmatpush.msra.mxu1 %v2351_v4 }
 0x447   : > { %v2348_v0 = vpop.f32.mrf.mxu0 }
 0x448   : > { %2387 = vmatmul.f32.vlgmr.msra.gmra.mxu1 %v2348_v0 }
 0x4c5   : > { %v2388_v61 = vpop.f32.mrf.mxu1 }
 0x4c6   : > { %v2389_v31 = vadd.f32 %v3136_v19, %v2388_v61 }
 0x4c8   : > { %2392 = vst.msk [vmem:[%s4958_s28] sm:$0x3] %vm2391_vm13, %v2389_v31 }
 0x4c9 PF: > { %s30_s24 = sadd.s32 1, %s3325_s24   ;;  %s4959_s25 = sld [smem:[#allocation14_spill]] }
 0x4ca   : > { %p27_p4 = scmp.ge.s32.totalorder %s30_s24, 8   ;;  %s4960_s17 = sld [smem:[#allocation22_spill]] }
 0x4cb   : > { %s4961_s18 = sld [smem:[#allocation15_spill]]  ;;  %s4968_s15 = smov %s3289_s16 }
 0x4cc   : > { %s4962_s19 = sld [smem:[#allocation16_spill]] }
 0x4cd   : > { %s4963_s20 = sld [smem:[#allocation20_spill]]  ;;  %29 = sbr.rel (!%p27_p4) target bundleno = 23 (0x17), region = 168 }
 0x4ce   : > { %s4964_s21 = sld [smem:[#allocation17_spill]] }
 0x4cf   : > { %s4965_s22 = sld [smem:[#allocation18_spill]]  ;;  %s4969_s16 = smov %s4959_s25 }
 0x4d0   : > { %s4966_s13 = sld [smem:[#allocation19_spill]] }
 0x4d1   : > { %s4967_s23 = sld [smem:[#allocation21_spill]] }
 0x4d2   :  { %2404 = vsyncpa [#allocation7], 1 }
 0x4d3   :  { %2406 = vsyncpa [#allocation7 + $0x1], 1 }
 0x4d4   :  { %2407 = vsyncpa [#allocation9], 1 }
 0x4d5   :  { %2409 = vsyncpa [#allocation9 + $0x1], 1 }

</bundles_post_ra>
